<compile_context>
chip_gen: v6e
topology: v6e:2x2x1
jax: 0.10.0
libtpu: 0.0.40
codegen_flags: <defaults>
</compile_context>

<pallas_src>
import functools
import math

import jax
import jax.numpy as jnp
from jax.experimental import pallas as pl
from jax.experimental.pallas import tpu as pltpu

NUM_BOND_TYPE = 6
NUM_BOND_DIRECTION = 3
NUM_ATOM_TYPE = 120
NUM_CHIRALITY_TAG = 3
BN_EPS = 1e-5

LANE = 128
TILE_N = 128


def _round_up(x, m):
    return (x + m - 1) // m * m


def _vmem_capacity_bytes():
    """Generation-aware VMEM capacity (falls back to the v7x 64 MiB floor)."""
    try:
        info = pltpu.get_tpu_info()
        for attr in ("vmem_capacity_bytes", "vmem_size_bytes", "vmem_bytes"):
            v = getattr(info, attr, None)
            if v:
                return int(v)
    except Exception:
        pass
    return 64 << 20


# ---------------------------------------------------------------------------
# Fused Pallas kernel: all GIN layers
#   grid = (num_layer, node_tiles + 1)
#   s in [0, nt)  : aggregation + MLP for row tile s, accumulate BN stats
#   s == nt       : BN (+ReLU) over all tiles (fori_loop on resident scratch)
# ---------------------------------------------------------------------------
def fused_gin_kernel(x0_hbm, a_ref, enode_ref, w1_ref, b1_ref, w2_ref, b2_ref,
                     gamma_ref, beta_ref, o_ref,
                     h_state, hpre, stat_sum, stat_sq,
                     *, num_layers, tile_n, nt, n_real, a_resident, mask_last):
    l = pl.program_id(0)
    s = pl.program_id(1)
    inv_n = 1.0 / float(n_real)

    # ---- compute steps: aggregation + GIN MLP, accumulate BN statistics ----
    @pl.when(s < nt)
    def _compute():
        # Load the initial node embeddings (HBM -> resident bf16 node state).
        @pl.when(jnp.logical_and(l == 0, s == 0))
        def _init_state():
            pltpu.sync_copy(x0_hbm, h_state)

        # Reset the BatchNorm accumulators at the start of every layer.
        @pl.when(s == 0)
        def _reset_stats():
            stat_sum[...] = jnp.zeros_like(stat_sum)
            stat_sq[...] = jnp.zeros_like(stat_sq)

        row0 = pl.multiple_of(s * tile_n, tile_n)
        if a_resident:
            a_blk = a_ref[pl.ds(row0, tile_n), :]        # (tile_n, N_pad) bf16
        else:
            a_blk = a_ref[...]                           # streamed row tile

        # bf16 x bf16 MXU matmuls with f32 accumulation.
        aggr = jnp.dot(a_blk, h_state[...],
                       preferred_element_type=jnp.float32) + enode_ref[...]
        h1 = jnp.maximum(
            jnp.dot(aggr.astype(jnp.bfloat16), w1_ref[...],
                    preferred_element_type=jnp.float32) + b1_ref[...], 0.0)
        hp = (jnp.dot(h1.astype(jnp.bfloat16), w2_ref[...],
                      preferred_element_type=jnp.float32) + b2_ref[...])

        # BN statistics; padded node rows only need masking on the last tile.
        if mask_last:
            @pl.when(s == nt - 1)
            def _stats_masked():
                rows = row0 + jax.lax.broadcasted_iota(jnp.int32, hp.shape, 0)
                hpm = jnp.where(rows < n_real, hp, 0.0)
                stat_sum[...] += jnp.sum(hpm, axis=0, keepdims=True)
                stat_sq[...] += jnp.sum(hpm * hpm, axis=0, keepdims=True)

            @pl.when(s < nt - 1)
            def _stats_plain():
                stat_sum[...] += jnp.sum(hp, axis=0, keepdims=True)
                stat_sq[...] += jnp.sum(hp * hp, axis=0, keepdims=True)
        else:
            stat_sum[...] += jnp.sum(hp, axis=0, keepdims=True)
            stat_sq[...] += jnp.sum(hp * hp, axis=0, keepdims=True)

        hpre[pl.ds(row0, tile_n), :] = hp

    # ---- single normalize step per layer: BN (+ReLU) over all row tiles ----
    @pl.when(s == nt)
    def _normalize():
        mean = stat_sum[...] * inv_n
        var = jnp.maximum(stat_sq[...] * inv_n - mean * mean, 0.0)
        scale = jax.lax.rsqrt(var + BN_EPS) * gamma_ref[...]
        shift = beta_ref[...] - mean * scale
        is_last = l == num_layers - 1

        def body(i, carry):
            r0 = pl.multiple_of(i * tile_n, tile_n)
            hn = hpre[pl.ds(r0, tile_n), :] * scale + shift   # BN output (pre-ReLU)
            # Always write the output block; the last layer's values win at
            # the (single) HBM writeback -> output is fully defined.
            o_ref[pl.ds(r0, tile_n), :] = hn
            h_next = jnp.where(is_last, hn, jnp.maximum(hn, 0.0))
            h_state[pl.ds(r0, tile_n), :] = h_next.astype(jnp.bfloat16)
            return carry

        if nt <= 8:
            jax.lax.fori_loop(0, nt, body, 0, unroll=True)
        else:
            jax.lax.fori_loop(0, nt, body, 0)


# ---------------------------------------------------------------------------
# Parameter initialization (deterministic, synthetic)
# ---------------------------------------------------------------------------
def xavier_uniform(key, shape):
    fan_in, fan_out = shape[0], shape[1]
    bound = math.sqrt(6.0 / (fan_in + fan_out))
    return jax.random.uniform(key, shape, jnp.float32, -bound, bound)


def init_params(key, num_layer, emb_dim):
    keys = jax.random.split(key, 2 + 6 * num_layer)
    params = {
        "x_emb1": xavier_uniform(keys[0], (NUM_ATOM_TYPE, emb_dim)),
        "x_emb2": xavier_uniform(keys[1], (NUM_CHIRALITY_TAG, emb_dim)),
        "layers": [],
    }
    for l in range(num_layer):
        k = keys[2 + 6 * l: 2 + 6 * (l + 1)]
        params["layers"].append({
            "edge_emb1": xavier_uniform(k[0], (NUM_BOND_TYPE, emb_dim)),
            "edge_emb2": xavier_uniform(k[1], (NUM_BOND_DIRECTION, emb_dim)),
            "w1": xavier_uniform(k[2], (emb_dim, 2 * emb_dim)),
            "b1": jax.random.uniform(k[3], (1, 2 * emb_dim), jnp.float32, -0.1, 0.1),
            "w2": xavier_uniform(k[4], (2 * emb_dim, emb_dim)),
            "b2": jax.random.uniform(k[5], (1, emb_dim), jnp.float32, -0.1, 0.1),
            "gamma": jnp.ones((1, emb_dim), jnp.float32),   # BatchNorm default init
            "beta": jnp.zeros((1, emb_dim), jnp.float32),
        })
    return params


# ---------------------------------------------------------------------------
# GNN forward (glue in plain JAX, hot path fused into one Pallas kernel)
# ---------------------------------------------------------------------------
def gnn_forward(params, x, edge_index, edge_attr, *, tile_n=TILE_N):
    n = x.shape[0]
    emb_dim = params["x_emb1"].shape[1]
    num_layer = len(params["layers"])

    d_pad = _round_up(emb_dim, LANE)
    hid_pad = _round_up(2 * emb_dim, LANE)
    n_pad = _round_up(n, tile_n)
    nt = n_pad // tile_n

    # initial node embedding: x_embedding1(x[:,0]) + x_embedding2(x[:,1])
    h0 = jnp.take(params["x_emb1"], x[:, 0], axis=0) + \
         jnp.take(params["x_emb2"], x[:, 1], axis=0)
    h0 = jnp.pad(h0, ((0, n_pad - n), (0, d_pad - emb_dim))).astype(jnp.bfloat16)

    # add self loops: (i, i) appended; self-loop edge_attr = [4, 0]
    self_loops = jnp.arange(n, dtype=edge_index.dtype)
    src = jnp.concatenate([edge_index[0], self_loops])
    dst = jnp.concatenate([edge_index[1], self_loops])
    sl_attr = jnp.zeros((n, 2), edge_attr.dtype).at[:, 0].set(4)
    ea = jnp.concatenate([edge_attr, sl_attr], axis=0)

    # dense dst<-src adjacency. NOTE: bf16 is exact for integer edge
    # multiplicities <= 256, which always holds for molecular graphs.
    adj = jnp.zeros((n_pad, n_pad), jnp.float32).at[dst, src].add(1.0)
    adj = adj.astype(jnp.bfloat16)

    # per-node incoming bond-type / bond-direction histograms
    h_type = jnp.zeros((n_pad, NUM_BOND_TYPE), jnp.float32).at[dst, ea[:, 0]].add(1.0)
    h_dir = jnp.zeros((n_pad, NUM_BOND_DIRECTION), jnp.float32).at[dst, ea[:, 1]].add(1.0)

    def pad2(a, r, c):
        return jnp.pad(a, ((0, r - a.shape[0]), (0, c - a.shape[1])))

    # stack per-layer parameters (zero-padded, lane-dense; weights in bf16)
    e_node = jnp.stack([
        pad2(h_type @ lp["edge_emb1"] + h_dir @ lp["edge_emb2"], n_pad, d_pad)
        for lp in params["layers"]])                                  # (L, N_pad, D_pad) f32
    w1 = jnp.stack([pad2(lp["w1"], d_pad, hid_pad)
                    for lp in params["layers"]]).astype(jnp.bfloat16)
    b1 = jnp.stack([pad2(lp["b1"], 1, hid_pad) for lp in params["layers"]])
    w2 = jnp.stack([pad2(lp["w2"], hid_pad, d_pad)
                    for lp in params["layers"]]).astype(jnp.bfloat16)
    b2 = jnp.stack([pad2(lp["b2"], 1, d_pad) for lp in params["layers"]])
    gamma = jnp.stack([pad2(lp["gamma"], 1, d_pad) for lp in params["layers"]])
    beta = jnp.stack([pad2(lp["beta"], 1, d_pad) for lp in params["layers"]])

    # --- generation-aware VMEM budgeting / adjacency residency --------------
    vmem_cap = _vmem_capacity_bytes()
    a_full_bytes = n_pad * n_pad * 2
    fixed_vmem = (
        n_pad * d_pad * 2                         # h_state scratch (bf16)
        + n_pad * d_pad * 4                       # hpre scratch (f32)
        + 2 * n_pad * d_pad * 4                   # output block (assume 2-deep)
        + 2 * tile_n * d_pad * 4                  # e_node blocks (2-deep)
        + 2 * (d_pad * hid_pad + hid_pad * d_pad) * 2   # w1 + w2 (bf16, 2-deep)
        + (2 << 20))                              # biases / BN params / headroom
    a_resident = fixed_vmem + 2 * a_full_bytes <= int(0.6 * vmem_cap)
    vmem_est = fixed_vmem + (2 * a_full_bytes if a_resident
                             else 2 * tile_n * n_pad * 2)
    vmem_limit = int(min(max(2 * vmem_est, 32 << 20), vmem_cap - (16 << 20)))

    # --- BlockSpecs ----------------------------------------------------------
    x0_spec = pl.BlockSpec(memory_space=pl.ANY)        # raw HBM; DMA'd once
    if a_resident:
        # constant index map -> A is DMA'd into VMEM exactly once.
        a_spec = pl.BlockSpec((n_pad, n_pad), lambda l, s: (0, 0))
    else:
        # stream row tiles during compute; park on the last-visited block
        # during the normalize step (no wasted re-fetch at the boundary).
        a_spec = pl.BlockSpec((tile_n, n_pad),
                              lambda l, s: (jnp.minimum(s, nt - 1), 0))
    enode_spec = pl.BlockSpec((None, tile_n, d_pad),
                              lambda l, s: (l, jnp.minimum(s, nt - 1), 0))
    w1_spec = pl.BlockSpec((None, d_pad, hid_pad), lambda l, s: (l, 0, 0))
    b1_spec = pl.BlockSpec((None, 1, hid_pad), lambda l, s: (l, 0, 0))
    w2_spec = pl.BlockSpec((None, hid_pad, d_pad), lambda l, s: (l, 0, 0))
    vec_spec = pl.BlockSpec((None, 1, d_pad), lambda l, s: (l, 0, 0))
    out_spec = pl.BlockSpec((n_pad, d_pad), lambda l, s: (0, 0))

    kernel = functools.partial(
        fused_gin_kernel, num_layers=num_layer, tile_n=tile_n, nt=nt,
        n_real=n, a_resident=a_resident, mask_last=(n < n_pad))

    out = pl.pallas_call(
        kernel,
        out_shape=jax.ShapeDtypeStruct((n_pad, d_pad), jnp.float32),
        grid_spec=pltpu.PrefetchScalarGridSpec(
            num_scalar_prefetch=0,
            grid=(num_layer, nt + 1),
            in_specs=[x0_spec, a_spec, enode_spec, w1_spec, b1_spec,
                      w2_spec, vec_spec, vec_spec, vec_spec],
            out_specs=out_spec,
            scratch_shapes=[
                pltpu.VMEM((n_pad, d_pad), jnp.bfloat16),   # h_state (resident h)
                pltpu.VMEM((n_pad, d_pad), jnp.float32),    # pre-BN activations
                pltpu.VMEM((1, d_pad), jnp.float32),        # BN sum
                pltpu.VMEM((1, d_pad), jnp.float32),        # BN sum of squares
            ]),
        compiler_params=pltpu.CompilerParams(
            # layer / step axes are sequentially dependent (resident node
            # state + cross-tile BN statistics) -> "arbitrary".
            dimension_semantics=("arbitrary", "arbitrary"),
            vmem_limit_bytes=vmem_limit),
    )(h0, adj, e_node, w1, b1, w2, b2, gamma, beta)

    return out[:n, :emb_dim]


# ---------------------------------------------------------------------------
# Pure-JAX (f32) reference for verification
# ---------------------------------------------------------------------------
def gnn_forward_ref(params, x, edge_index, edge_attr):
    num_nodes = x.shape[0]
    h = jnp.take(params["x_emb1"], x[:, 0], axis=0) + \
        jnp.take(params["x_emb2"], x[:, 1], axis=0)
    self_loops = jnp.arange(num_nodes, dtype=edge_index.dtype)
    src = jnp.concatenate([edge_index[0], self_loops])
    dst = jnp.concatenate([edge_index[1], self_loops])
    self_loop_attr = jnp.zeros((num_nodes, 2), edge_attr.dtype).at[:, 0].set(4)
    ea = jnp.concatenate([edge_attr, self_loop_attr], axis=0)
    num_layer = len(params["layers"])
    for layer in range(num_layer):
        p = params["layers"][layer]
        e = jnp.take(p["edge_emb1"], ea[:, 0], axis=0) + \
            jnp.take(p["edge_emb2"], ea[:, 1], axis=0)
        msg = h[src] + e
        aggr = jax.ops.segment_sum(msg, dst, num_segments=num_nodes)
        h1 = jnp.maximum(aggr @ p["w1"] + p["b1"], 0.0)
        hh = h1 @ p["w2"] + p["b2"]
        mean = jnp.mean(hh, axis=0, keepdims=True)
        var = jnp.mean((hh - mean) ** 2, axis=0, keepdims=True)
        hh = (hh - mean) * jax.lax.rsqrt(var + BN_EPS) * p["gamma"] + p["beta"]
        if layer != num_layer - 1:
            hh = jnp.maximum(hh, 0.0)
        h = hh
    return h


if __name__ == "__main__":
    key = jax.random.PRNGKey(0)
    # Small graph; N > TILE_N so the multi-tile / masked paths are exercised.
    N, E, EMB_DIM, NUM_LAYER = 200, 400, 32, 2

    k1, k2, k3, k4, k5, kp = jax.random.split(key, 6)
    x = jnp.stack([
        jax.random.randint(k1, (N,), 0, NUM_ATOM_TYPE, dtype=jnp.int32),
        jax.random.randint(k2, (N,), 0, NUM_CHIRALITY_TAG, dtype=jnp.int32),
    ], axis=1)                                                    # (N, 2)
    edge_index = jax.random.randint(k3, (2, E), 0, N, dtype=jnp.int32)   # (2, E)
    edge_attr = jnp.stack([
        jax.random.randint(k4, (E,), 0, NUM_BOND_TYPE, dtype=jnp.int32),
        jax.random.randint(k5, (E,), 0, NUM_BOND_DIRECTION, dtype=jnp.int32),
    ], axis=1)                                                    # (E, 2)

    params = init_params(kp, NUM_LAYER, EMB_DIM)

    out = gnn_forward(params, x, edge_index, edge_attr)
    out = jax.block_until_ready(out)

    ref = jax.block_until_ready(gnn_forward_ref(params, x, edge_index, edge_attr))
    assert out.shape == (N, EMB_DIM)
    # bf16 MXU operands (h / A / w1 / w2) + training-mode BatchNorm amplifies
    # rounding error -> compare against the f32 reference at a bf16-level
    # tolerance; real kernel bugs produce O(1) errors and still fail this.
    assert jnp.allclose(out, ref, atol=5e-2, rtol=5e-2), "mismatch vs reference"

    print("KERNEL_OK")
</pallas_src>

<mosaic_0001>
module attributes {stable_mosaic.version = 11 : i64} {
  func.func @fused_gin_kernel(%arg0: i32, %arg1: i32, %arg2: memref<256x128xbf16, #tpu.memory_space<any>>, %arg3: memref<256x256xbf16, #tpu.memory_space<vmem>>, %arg4: memref<1x128x128xf32, #tpu.memory_space<vmem>>, %arg5: memref<1x128x128xbf16, #tpu.memory_space<vmem>>, %arg6: memref<1x1x128xf32, #tpu.memory_space<vmem>>, %arg7: memref<1x128x128xbf16, #tpu.memory_space<vmem>>, %arg8: memref<1x1x128xf32, #tpu.memory_space<vmem>>, %arg9: memref<1x1x128xf32, #tpu.memory_space<vmem>>, %arg10: memref<1x1x128xf32, #tpu.memory_space<vmem>>, %arg11: memref<256x128xf32, #tpu.memory_space<vmem>>, %arg12: memref<256x128xbf16, #tpu.memory_space<vmem>>, %arg13: memref<256x128xf32, #tpu.memory_space<vmem>>, %arg14: memref<1x128xf32, #tpu.memory_space<vmem>>, %arg15: memref<1x128xf32, #tpu.memory_space<vmem>>) attributes {dimension_semantics = [#tpu.dimension_semantics<arbitrary>, #tpu.dimension_semantics<arbitrary>], iteration_bounds = array<i64: 2, 3>, scalar_prefetch = 0 : i64, scratch_operands = 4 : i64, tpu.core_type = #tpu.core_type<tc>, window_params = [{}, {pipeline_mode = #tpu.pipeline_mode<synchronous>, transform_indices = @transform_1, window_bounds = array<i64: 256, 256>}, {transform_indices = @transform_2, window_bounds = array<i64: 1, 128, 128>}, {transform_indices = @transform_3, window_bounds = array<i64: 1, 128, 128>}, {transform_indices = @transform_4, window_bounds = array<i64: 1, 1, 128>}, {transform_indices = @transform_5, window_bounds = array<i64: 1, 128, 128>}, {transform_indices = @transform_6, window_bounds = array<i64: 1, 1, 128>}, {transform_indices = @transform_7, window_bounds = array<i64: 1, 1, 128>}, {transform_indices = @transform_8, window_bounds = array<i64: 1, 1, 128>}, {pipeline_mode = #tpu.pipeline_mode<synchronous>, transform_indices = @transform_9, window_bounds = array<i64: 256, 128>}]} {
    %c2_i32 = arith.constant 2 : i32
    %0 = arith.cmpi slt, %arg1, %c2_i32 : i32
    %1 = arith.extui %0 : i1 to i32
    %c0_i32 = arith.constant 0 : i32
    %2 = arith.cmpi ne, %1, %c0_i32 : i32
    scf.if %2 {
      %c0_i32_2 = arith.constant 0 : i32
      %6 = arith.cmpi eq, %arg0, %c0_i32_2 : i32
      %c0_i32_3 = arith.constant 0 : i32
      %7 = arith.cmpi eq, %arg1, %c0_i32_3 : i32
      %8 = arith.andi %6, %7 : i1
      %9 = arith.extui %8 : i1 to i32
      %c0_i32_4 = arith.constant 0 : i32
      %10 = arith.cmpi ne, %9, %c0_i32_4 : i32
      scf.if %10 {
        "tpu.region"() ({
          %49 = tpu.sem_alloc : memref<!tpu.dma_semaphore, #tpu.memory_space<semaphore_mem>>
          tpu.enqueue_dma source(%arg2 : memref<256x128xbf16, #tpu.memory_space<any>>) target(%arg12 : memref<256x128xbf16, #tpu.memory_space<vmem>>) target_semaphore(%49 : memref<!tpu.dma_semaphore, #tpu.memory_space<semaphore_mem>>)
          tpu.wait_dma2 semaphore(%49 : memref<!tpu.dma_semaphore, #tpu.memory_space<semaphore_mem>>) src(%arg2 : memref<256x128xbf16, #tpu.memory_space<any>>) dst(%arg12 : memref<256x128xbf16, #tpu.memory_space<vmem>>)
          tpu.yield
        }) : () -> ()
      } else {
      }
      %c0_i32_5 = arith.constant 0 : i32
      %11 = arith.cmpi eq, %arg1, %c0_i32_5 : i32
      %12 = arith.extui %11 : i1 to i32
      %c0_i32_6 = arith.constant 0 : i32
      %13 = arith.cmpi ne, %12, %c0_i32_6 : i32
      scf.if %13 {
        %cst_31 = arith.constant 0.000000e+00 : f32
        %49 = vector.broadcast %cst_31 : f32 to vector<1x128xf32>
        %c0_32 = arith.constant 0 : index
        %c0_33 = arith.constant 0 : index
        %50 = vector.load %arg14[%c0_32, %c0_33] : memref<1x128xf32, #tpu.memory_space<vmem>>, vector<1x128xf32>
        tpu.vector_store %arg14[%c0_32, %c0_33], %49 {strides = array<i32>} : memref<1x128xf32, #tpu.memory_space<vmem>>, vector<1x128xf32>,
        %cst_34 = arith.constant 0.000000e+00 : f32
        %51 = vector.broadcast %cst_34 : f32 to vector<1x128xf32>
        %c0_35 = arith.constant 0 : index
        %c0_36 = arith.constant 0 : index
        %52 = vector.load %arg15[%c0_35, %c0_36] : memref<1x128xf32, #tpu.memory_space<vmem>>, vector<1x128xf32>
        tpu.vector_store %arg15[%c0_35, %c0_36], %51 {strides = array<i32>} : memref<1x128xf32, #tpu.memory_space<vmem>>, vector<1x128xf32>,
      } else {
      }
      %c128_i32 = arith.constant 128 : i32
      %14 = arith.muli %arg1, %c128_i32 : i32
      %15 = tpu.assume_multiple %14, 128 : i32
      %16 = arith.index_cast %15 : i32 to index
      %c0 = arith.constant 0 : index
      %17 = vector.load %arg3[%16, %c0] : memref<256x256xbf16, #tpu.memory_space<vmem>>, vector<128x256xbf16>
      %c0_7 = arith.constant 0 : index
      %c0_8 = arith.constant 0 : index
      %18 = vector.load %arg12[%c0_7, %c0_8] : memref<256x128xbf16, #tpu.memory_space<vmem>>, vector<256x128xbf16>
      %cst = arith.constant dense<0.000000e+00> : vector<128x128xf32>
      %19 = tpu.matmul %17, %18, %cst {dimension_numbers = #tpu.dot_dimension_numbers<[1], [0], [0], [1], [0, 0, 1, 1], [], []>} : vector<128x256xbf16>, vector<256x128xbf16>, vector<128x128xf32> -> vector<128x128xf32>
      %c0_9 = arith.constant 0 : index
      %c0_10 = arith.constant 0 : index
      %c0_11 = arith.constant 0 : index
      %20 = vector.load %arg4[%c0_9, %c0_10, %c0_11] : memref<1x128x128xf32, #tpu.memory_space<vmem>>, vector<1x128x128xf32>
      %21 = vector.shape_cast %20 : vector<1x128x128xf32> to vector<128x128xf32>
      %22 = arith.addf %19, %21 : vector<128x128xf32>
      %23 = arith.truncf %22 : vector<128x128xf32> to vector<128x128xbf16>
      %c0_12 = arith.constant 0 : index
      %c0_13 = arith.constant 0 : index
      %c0_14 = arith.constant 0 : index
      %24 = vector.load %arg5[%c0_12, %c0_13, %c0_14] : memref<1x128x128xbf16, #tpu.memory_space<vmem>>, vector<1x128x128xbf16>
      %25 = vector.shape_cast %24 : vector<1x128x128xbf16> to vector<128x128xbf16>
      %cst_15 = arith.constant dense<0.000000e+00> : vector<128x128xf32>
      %26 = tpu.matmul %23, %25, %cst_15 {dimension_numbers = #tpu.dot_dimension_numbers<[1], [0], [0], [1], [0, 0, 1, 1], [], []>} : vector<128x128xbf16>, vector<128x128xbf16>, vector<128x128xf32> -> vector<128x128xf32>
      %c0_16 = arith.constant 0 : index
      %c0_17 = arith.constant 0 : index
      %c0_18 = arith.constant 0 : index
      %27 = vector.load %arg6[%c0_16, %c0_17, %c0_18] : memref<1x1x128xf32, #tpu.memory_space<vmem>>, vector<1x1x128xf32>
      %28 = vector.shape_cast %27 : vector<1x1x128xf32> to vector<1x128xf32>
      %29 = vector.broadcast %28 : vector<1x128xf32> to vector<128x128xf32>
      %30 = arith.addf %26, %29 : vector<128x128xf32>
      %cst_19 = arith.constant 0.000000e+00 : f32
      %31 = vector.broadcast %cst_19 : f32 to vector<128x128xf32>
      %32 = arith.maximumf %30, %31 : vector<128x128xf32>
      %33 = arith.truncf %32 : vector<128x128xf32> to vector<128x128xbf16>
      %c0_20 = arith.constant 0 : index
      %c0_21 = arith.constant 0 : index
      %c0_22 = arith.constant 0 : index
      %34 = vector.load %arg7[%c0_20, %c0_21, %c0_22] : memref<1x128x128xbf16, #tpu.memory_space<vmem>>, vector<1x128x128xbf16>
      %35 = vector.shape_cast %34 : vector<1x128x128xbf16> to vector<128x128xbf16>
      %cst_23 = arith.constant dense<0.000000e+00> : vector<128x128xf32>
      %36 = tpu.matmul %33, %35, %cst_23 {dimension_numbers = #tpu.dot_dimension_numbers<[1], [0], [0], [1], [0, 0, 1, 1], [], []>} : vector<128x128xbf16>, vector<128x128xbf16>, vector<128x128xf32> -> vector<128x128xf32>
      %c0_24 = arith.constant 0 : index
      %c0_25 = arith.constant 0 : index
      %c0_26 = arith.constant 0 : index
      %37 = vector.load %arg8[%c0_24, %c0_25, %c0_26] : memref<1x1x128xf32, #tpu.memory_space<vmem>>, vector<1x1x128xf32>
      %38 = vector.shape_cast %37 : vector<1x1x128xf32> to vector<1x128xf32>
      %39 = vector.broadcast %38 : vector<1x128xf32> to vector<128x128xf32>
      %40 = arith.addf %36, %39 : vector<128x128xf32>
      %c1_i32 = arith.constant 1 : i32
      %41 = arith.cmpi eq, %arg1, %c1_i32 : i32
      %42 = arith.extui %41 : i1 to i32
      %c0_i32_27 = arith.constant 0 : i32
      %43 = arith.cmpi ne, %42, %c0_i32_27 : i32
      scf.if %43 {
        %49 = tpu.iota {dimensions = array<i32: 0>} : vector<128x128xi32>
        %50 = vector.broadcast %15 : i32 to vector<128x128xi32>
        %51 = arith.addi %50, %49 : vector<128x128xi32>
        %c200_i32 = arith.constant 200 : i32
        %52 = vector.broadcast %c200_i32 : i32 to vector<128x128xi32>
        %53 = arith.cmpi slt, %51, %52 : vector<128x128xi32>
        %cst_31 = arith.constant 0.000000e+00 : f32
        %54 = vector.broadcast %cst_31 : f32 to vector<128x128xf32>
        %55 = arith.select %53, %40, %54 : vector<128x128xi1>, vector<128x128xf32>
        %c0_32 = arith.constant 0 : index
        %c0_33 = arith.constant 0 : index
        %56 = vector.load %arg14[%c0_32, %c0_33] : memref<1x128xf32, #tpu.memory_space<vmem>>, vector<1x128xf32>
        %cst_34 = arith.constant dense<0.000000e+00> : vector<128xf32>
        %57 = vector.multi_reduction <add>, %55, %cst_34 [0] : vector<128x128xf32> to vector<128xf32>
        %58 = vector.shape_cast %57 : vector<128xf32> to vector<1x128xf32>
        %59 = arith.addf %56, %58 : vector<1x128xf32>
        %c0_35 = arith.constant 0 : index
        %c0_36 = arith.constant 0 : index
        %60 = vector.load %arg14[%c0_35, %c0_36] : memref<1x128xf32, #tpu.memory_space<vmem>>, vector<1x128xf32>
        tpu.vector_store %arg14[%c0_35, %c0_36], %59 {strides = array<i32>} : memref<1x128xf32, #tpu.memory_space<vmem>>, vector<1x128xf32>,
        %c0_37 = arith.constant 0 : index
        %c0_38 = arith.constant 0 : index
        %61 = vector.load %arg15[%c0_37, %c0_38] : memref<1x128xf32, #tpu.memory_space<vmem>>, vector<1x128xf32>
        %62 = arith.mulf %55, %55 : vector<128x128xf32>
        %cst_39 = arith.constant dense<0.000000e+00> : vector<128xf32>
        %63 = vector.multi_reduction <add>, %62, %cst_39 [0] : vector<128x128xf32> to vector<128xf32>
        %64 = vector.shape_cast %63 : vector<128xf32> to vector<1x128xf32>
        %65 = arith.addf %61, %64 : vector<1x128xf32>
        %c0_40 = arith.constant 0 : index
        %c0_41 = arith.constant 0 : index
        %66 = vector.load %arg15[%c0_40, %c0_41] : memref<1x128xf32, #tpu.memory_space<vmem>>, vector<1x128xf32>
        tpu.vector_store %arg15[%c0_40, %c0_41], %65 {strides = array<i32>} : memref<1x128xf32, #tpu.memory_space<vmem>>, vector<1x128xf32>,
      } else {
      }
      %c1_i32_28 = arith.constant 1 : i32
      %44 = arith.cmpi slt, %arg1, %c1_i32_28 : i32
      %45 = arith.extui %44 : i1 to i32
      %c0_i32_29 = arith.constant 0 : i32
      %46 = arith.cmpi ne, %45, %c0_i32_29 : i32
      scf.if %46 {
        %c0_31 = arith.constant 0 : index
        %c0_32 = arith.constant 0 : index
        %49 = vector.load %arg14[%c0_31, %c0_32] : memref<1x128xf32, #tpu.memory_space<vmem>>, vector<1x128xf32>
        %cst_33 = arith.constant dense<0.000000e+00> : vector<128xf32>
        %50 = vector.multi_reduction <add>, %40, %cst_33 [0] : vector<128x128xf32> to vector<128xf32>
        %51 = vector.shape_cast %50 : vector<128xf32> to vector<1x128xf32>
        %52 = arith.addf %49, %51 : vector<1x128xf32>
        %c0_34 = arith.constant 0 : index
        %c0_35 = arith.constant 0 : index
        %53 = vector.load %arg14[%c0_34, %c0_35] : memref<1x128xf32, #tpu.memory_space<vmem>>, vector<1x128xf32>
        tpu.vector_store %arg14[%c0_34, %c0_35], %52 {strides = array<i32>} : memref<1x128xf32, #tpu.memory_space<vmem>>, vector<1x128xf32>,
        %c0_36 = arith.constant 0 : index
        %c0_37 = arith.constant 0 : index
        %54 = vector.load %arg15[%c0_36, %c0_37] : memref<1x128xf32, #tpu.memory_space<vmem>>, vector<1x128xf32>
        %55 = arith.mulf %40, %40 : vector<128x128xf32>
        %cst_38 = arith.constant dense<0.000000e+00> : vector<128xf32>
        %56 = vector.multi_reduction <add>, %55, %cst_38 [0] : vector<128x128xf32> to vector<128xf32>
        %57 = vector.shape_cast %56 : vector<128xf32> to vector<1x128xf32>
        %58 = arith.addf %54, %57 : vector<1x128xf32>
        %c0_39 = arith.constant 0 : index
        %c0_40 = arith.constant 0 : index
        %59 = vector.load %arg15[%c0_39, %c0_40] : memref<1x128xf32, #tpu.memory_space<vmem>>, vector<1x128xf32>
        tpu.vector_store %arg15[%c0_39, %c0_40], %58 {strides = array<i32>} : memref<1x128xf32, #tpu.memory_space<vmem>>, vector<1x128xf32>,
      } else {
      }
      %47 = arith.index_cast %15 : i32 to index
      %c0_30 = arith.constant 0 : index
      %48 = vector.load %arg13[%47, %c0_30] : memref<256x128xf32, #tpu.memory_space<vmem>>, vector<128x128xf32>
      tpu.vector_store %arg13[%47, %c0_30], %40 {strides = array<i32>} : memref<256x128xf32, #tpu.memory_space<vmem>>, vector<128x128xf32>,
    } else {
    }
    %c2_i32_0 = arith.constant 2 : i32
    %3 = arith.cmpi eq, %arg1, %c2_i32_0 : i32
    %4 = arith.extui %3 : i1 to i32
    %c0_i32_1 = arith.constant 0 : i32
    %5 = arith.cmpi ne, %4, %c0_i32_1 : i32
    scf.if %5 {
      %c0 = arith.constant 0 : index
      %c0_2 = arith.constant 0 : index
      %6 = vector.load %arg14[%c0, %c0_2] : memref<1x128xf32, #tpu.memory_space<vmem>>, vector<1x128xf32>
      %cst = arith.constant 5.000000e-03 : f32
      %7 = vector.broadcast %cst : f32 to vector<1x128xf32>
      %8 = arith.mulf %6, %7 : vector<1x128xf32>
      %c0_3 = arith.constant 0 : index
      %c0_4 = arith.constant 0 : index
      %9 = vector.load %arg15[%c0_3, %c0_4] : memref<1x128xf32, #tpu.memory_space<vmem>>, vector<1x128xf32>
      %cst_5 = arith.constant 5.000000e-03 : f32
      %10 = vector.broadcast %cst_5 : f32 to vector<1x128xf32>
      %11 = arith.mulf %9, %10 : vector<1x128xf32>
      %12 = arith.mulf %8, %8 : vector<1x128xf32>
      %13 = arith.subf %11, %12 : vector<1x128xf32>
      %cst_6 = arith.constant 0.000000e+00 : f32
      %14 = vector.broadcast %cst_6 : f32 to vector<1x128xf32>
      %15 = arith.maximumf %13, %14 : vector<1x128xf32>
      %cst_7 = arith.constant 9.99999974E-6 : f32
      %16 = vector.broadcast %cst_7 : f32 to vector<1x128xf32>
      %17 = arith.addf %15, %16 : vector<1x128xf32>
      %18 = math.rsqrt %17 : vector<1x128xf32>
      %c0_8 = arith.constant 0 : index
      %c0_9 = arith.constant 0 : index
      %c0_10 = arith.constant 0 : index
      %19 = vector.load %arg9[%c0_8, %c0_9, %c0_10] : memref<1x1x128xf32, #tpu.memory_space<vmem>>, vector<1x1x128xf32>
      %20 = vector.shape_cast %19 : vector<1x1x128xf32> to vector<1x128xf32>
      %21 = arith.mulf %18, %20 : vector<1x128xf32>
      %c0_11 = arith.constant 0 : index
      %c0_12 = arith.constant 0 : index
      %c0_13 = arith.constant 0 : index
      %22 = vector.load %arg10[%c0_11, %c0_12, %c0_13] : memref<1x1x128xf32, #tpu.memory_space<vmem>>, vector<1x1x128xf32>
      %23 = vector.shape_cast %22 : vector<1x1x128xf32> to vector<1x128xf32>
      %24 = arith.mulf %8, %21 : vector<1x128xf32>
      %25 = arith.subf %23, %24 : vector<1x128xf32>
      %c1_i32 = arith.constant 1 : i32
      %26 = arith.cmpi eq, %arg0, %c1_i32 : i32
      %c0_i32_14 = arith.constant 0 : i32
      %c128_i32 = arith.constant 128 : i32
      %27 = arith.muli %c0_i32_14, %c128_i32 : i32
      %28 = tpu.assume_multiple %27, 128 : i32
      %29 = arith.index_cast %28 : i32 to index
      %c0_15 = arith.constant 0 : index
      %30 = vector.load %arg13[%29, %c0_15] : memref<256x128xf32, #tpu.memory_space<vmem>>, vector<128x128xf32>
      %31 = vector.broadcast %21 : vector<1x128xf32> to vector<128x128xf32>
      %32 = arith.mulf %30, %31 : vector<128x128xf32>
      %33 = vector.broadcast %25 : vector<1x128xf32> to vector<128x128xf32>
      %34 = arith.addf %32, %33 : vector<128x128xf32>
      %35 = arith.index_cast %28 : i32 to index
      %c0_16 = arith.constant 0 : index
      %36 = vector.load %arg11[%35, %c0_16] : memref<256x128xf32, #tpu.memory_space<vmem>>, vector<128x128xf32>
      tpu.vector_store %arg11[%35, %c0_16], %34 {strides = array<i32>} : memref<256x128xf32, #tpu.memory_space<vmem>>, vector<128x128xf32>,
      %cst_17 = arith.constant 0.000000e+00 : f32
      %37 = vector.broadcast %cst_17 : f32 to vector<128x128xf32>
      %38 = arith.maximumf %34, %37 : vector<128x128xf32>
      %39 = arith.select %26, %34, %38 : vector<128x128xf32>
      %40 = arith.truncf %39 : vector<128x128xf32> to vector<128x128xbf16>
      %41 = arith.index_cast %28 : i32 to index
      %c0_18 = arith.constant 0 : index
      %42 = vector.load %arg12[%41, %c0_18] : memref<256x128xbf16, #tpu.memory_space<vmem>>, vector<128x128xbf16>
      tpu.vector_store %arg12[%41, %c0_18], %40 {strides = array<i32>} : memref<256x128xbf16, #tpu.memory_space<vmem>>, vector<128x128xbf16>,
      %c1_i32_19 = arith.constant 1 : i32
      %c128_i32_20 = arith.constant 128 : i32
      %43 = arith.muli %c1_i32_19, %c128_i32_20 : i32
      %44 = tpu.assume_multiple %43, 128 : i32
      %45 = arith.index_cast %44 : i32 to index
      %c0_21 = arith.constant 0 : index
      %46 = vector.load %arg13[%45, %c0_21] : memref<256x128xf32, #tpu.memory_space<vmem>>, vector<128x128xf32>
      %47 = vector.broadcast %21 : vector<1x128xf32> to vector<128x128xf32>
      %48 = arith.mulf %46, %47 : vector<128x128xf32>
      %49 = vector.broadcast %25 : vector<1x128xf32> to vector<128x128xf32>
      %50 = arith.addf %48, %49 : vector<128x128xf32>
      %51 = arith.index_cast %44 : i32 to index
      %c0_22 = arith.constant 0 : index
      %52 = vector.load %arg11[%51, %c0_22] : memref<256x128xf32, #tpu.memory_space<vmem>>, vector<128x128xf32>
      tpu.vector_store %arg11[%51, %c0_22], %50 {strides = array<i32>} : memref<256x128xf32, #tpu.memory_space<vmem>>, vector<128x128xf32>,
      %cst_23 = arith.constant 0.000000e+00 : f32
      %53 = vector.broadcast %cst_23 : f32 to vector<128x128xf32>
      %54 = arith.maximumf %50, %53 : vector<128x128xf32>
      %55 = arith.select %26, %50, %54 : vector<128x128xf32>
      %56 = arith.truncf %55 : vector<128x128xf32> to vector<128x128xbf16>
      %57 = arith.index_cast %44 : i32 to index
      %c0_24 = arith.constant 0 : index
      %58 = vector.load %arg12[%57, %c0_24] : memref<256x128xbf16, #tpu.memory_space<vmem>>, vector<128x128xbf16>
      tpu.vector_store %arg12[%57, %c0_24], %56 {strides = array<i32>} : memref<256x128xbf16, #tpu.memory_space<vmem>>, vector<128x128xbf16>,
      %c2_i32_25 = arith.constant 2 : i32
    } else {
    }
    return
  }
  func.func @transform_1(%arg0: i32, %arg1: i32) -> (i32, i32) {
    %c0_i32 = arith.constant 0 : i32
    %c0_i32_0 = arith.constant 0 : i32
    %c0_i32_1 = arith.constant 0 : i32
    return %c0_i32, %c0_i32_0 : i32, i32
  }
  func.func @transform_2(%arg0: i32, %arg1: i32) -> (i32, i32, i32) {
    %c1_i32 = arith.constant 1 : i32
    %0 = arith.minsi %arg1, %c1_i32 : i32
    %c0_i32 = arith.constant 0 : i32
    %c0_i32_0 = arith.constant 0 : i32
    return %arg0, %0, %c0_i32 : i32, i32, i32
  }
  func.func @transform_3(%arg0: i32, %arg1: i32) -> (i32, i32, i32) {
    %c0_i32 = arith.constant 0 : i32
    %c0_i32_0 = arith.constant 0 : i32
    %c0_i32_1 = arith.constant 0 : i32
    return %arg0, %c0_i32, %c0_i32_0 : i32, i32, i32
  }
  func.func @transform_4(%arg0: i32, %arg1: i32) -> (i32, i32, i32) {
    %c0_i32 = arith.constant 0 : i32
    %c0_i32_0 = arith.constant 0 : i32
    %c0_i32_1 = arith.constant 0 : i32
    return %arg0, %c0_i32, %c0_i32_0 : i32, i32, i32
  }
  func.func @transform_5(%arg0: i32, %arg1: i32) -> (i32, i32, i32) {
    %c0_i32 = arith.constant 0 : i32
    %c0_i32_0 = arith.constant 0 : i32
    %c0_i32_1 = arith.constant 0 : i32
    return %arg0, %c0_i32, %c0_i32_0 : i32, i32, i32
  }
  func.func @transform_6(%arg0: i32, %arg1: i32) -> (i32, i32, i32) {
    %c0_i32 = arith.constant 0 : i32
    %c0_i32_0 = arith.constant 0 : i32
    %c0_i32_1 = arith.constant 0 : i32
    return %arg0, %c0_i32, %c0_i32_0 : i32, i32, i32
  }
  func.func @transform_7(%arg0: i32, %arg1: i32) -> (i32, i32, i32) {
    %c0_i32 = arith.constant 0 : i32
    %c0_i32_0 = arith.constant 0 : i32
    %c0_i32_1 = arith.constant 0 : i32
    return %arg0, %c0_i32, %c0_i32_0 : i32, i32, i32
  }
  func.func @transform_8(%arg0: i32, %arg1: i32) -> (i32, i32, i32) {
    %c0_i32 = arith.constant 0 : i32
    %c0_i32_0 = arith.constant 0 : i32
    %c0_i32_1 = arith.constant 0 : i32
    return %arg0, %c0_i32, %c0_i32_0 : i32, i32, i32
  }
  func.func @transform_9(%arg0: i32, %arg1: i32) -> (i32, i32) {
    %c0_i32 = arith.constant 0 : i32
    %c0_i32_0 = arith.constant 0 : i32
    %c0_i32_1 = arith.constant 0 : i32
    return %c0_i32, %c0_i32_0 : i32, i32
  }
}

</mosaic_0001>

<bundles_post_ra>
// kernel: tpu_custom_call.1
= control target key start
LH: loop header
LB: loop body
LE: loop exit
PB: predicated region body
PF: predicated region fallthrough
CT: control target
= control target key end

     0   :  { %s3581_s0 = inlined_call_operand.hbm [shape: bf16[256,128], index: 0, kind: input, shape index: {}]   ;;  %s3582_s1 = inlined_call_operand.hbm [shape: bf16[256,256], index: 1, kind: input, shape index: {}]   ;;  %s3583_s2 = inlined_call_operand.hbm [shape: f32[2,256,128], index: 2, kind: input, shape index: {}]   ;;  %s3584_s3 = inlined_call_operand.hbm [shape: bf16[2,128,128], index: 3, kind: input, shape index: {}]   ;;  %s3585_s4 = inlined_call_operand.vmem [shape: f32[2,1,128], index: 4, kind: input, shape index: {}]   ;;  %s3586_s5 = inlined_call_operand.hbm [shape: bf16[2,128,128], index: 5, kind: input, shape index: {}]   ;;  %s3587_s6 = inlined_call_operand.vmem [shape: f32[2,1,128], index: 6, kind: input, shape index: {}]   ;;  %s3588_s7 = inlined_call_operand.vmem [shape: f32[2,1,128], index: 7, kind: input, shape index: {}]   ;;  %s3589_s8 = inlined_call_operand.vmem [shape: f32[2,1,128], index: 8, kind: input, shape index: {}]   ;;  %s3590_s9 = inlined_call_operand.hbm [shape: f32[256,128], index: 9, kind: output, shape index: {}]  }
   0x1   :  { %3600 = sst [smem:[#allocation32_spill]] %s3581_s0 }
   0x2   :  { %3601 = sst [smem:[#allocation33_spill]] %s3582_s1 }
   0x3   :  { %3602 = sst [smem:[#allocation34_spill]] %s3583_s2 }
   0x4   :  { %3603 = sst [smem:[#allocation35_spill]] %s3584_s3 }
   0x5   :  { %3604 = sst [smem:[#allocation36_spill]] %s3585_s4 }
   0x6   :  { %3605 = sst [smem:[#allocation37_spill]] %s3587_s6 }
   0x7   :  { %3606 = sst [smem:[#allocation38_spill]] %s3588_s7 }
   0x8   :  { %3607 = sst [smem:[#allocation39_spill]] %s3589_s8 }
   0x9   :  { %3608 = sst [smem:[#allocation40_spill]] %s3590_s9 }
   0xa   :  { %14 = vsyncpa [#allocation7], 0 }
   0xb   :  { %15 = vsyncpa [#allocation10], 0 }
   0xc   :  { %17 = vsyncpa [#allocation10 + $0x1], 0 }
   0xd   :  { %18 = vsyncpa [#allocation13], 0 }
   0xe   :  { %20 = vsyncpa [#allocation13 + $0x1], 0 }
   0xf   :  { %21 = vsyncpa [#allocation8], 0  ;;  %s2923_s30 = smov 0   ;;  %s2925_s10 = smov 0  }
  0x10   :  { %s2927_s11 = smov 0   ;;  %s2929_s12 = smov 0  }
  0x11   :  { %s2931_s13 = smov 0   ;;  %s2933_s14 = smov 0  }
  0x12   :  { %s2935_s15 = smov 0   ;;  %s2937_s16 = smov 0  }
  0x13   :  { %s2939_s17 = smov 0   ;;  %s2941_s18 = smov 0  }
  0x14   :  { %s2943_s19 = smov 0  }
  0x15 LB: > { %3609 = sst [smem:[#allocation26_spill]] %s2842_s15  ;;  %s36_s20 = sadd.s32 1, %s2850_s17  ;;  %s2858_s19 = sphi %s2943_s19, %s27_s19   ;;  %s2854_s18 = sphi %s2941_s18, %s3661_s18   ;;  %s2850_s17 = sphi %s2939_s17, %s3652_s17   ;;  %s2846_s16 = sphi %s2937_s16, %s3660_s16   ;;  %s2842_s15 = sphi %s2935_s15, %s3651_s15   ;;  %s2838_s14 = sphi %s2933_s14, %s3659_s14   ;;  %s2834_s13 = sphi %s2931_s13, %s3658_s13   ;;  %s2830_s12 = sphi %s2929_s12, %s3657_s12   ;;  %s2826_s11 = sphi %s2927_s11, %s3656_s11   ;;  %s2822_s10 = sphi %s2925_s10, %s3655_s10   ;;  %s2818_s30 = sphi %s2923_s30, %s3654_s30  }
  0x16   : > { %3610 = sst [smem:[#allocation27_spill]] %s2846_s16  ;;  %s39_s21 = sadd.s32 1, %s2854_s18 }
  0x17   : > { %3611 = sst [smem:[#allocation28_spill]] %s2850_s17  ;;  %p37_p0 = scmp.ge.s32.totalorder %s36_s20, 3 }
  0x18   : > { %p64_p1 = scmp.lt.s32.totalorder %s2850_s17, 1  ;;  %s73_s22 = sadd.s32 1, %s2838_s14 }
  0x19   : > { %p80_p2 = scmp.ne.s32.totalorder %s2838_s14, %s2834_s13  ;;  %s3663_s20 = smov (%p37_p0, %s36_s20), 0 }
  0x1a   : > { %3612 = sst [smem:[#allocation29_spill]] %s3663_s20  ;;  %s3665_s21 = smov (!%p37_p0, %s39_s21), %s2854_s18 }
  0x1b   : > { %s65_s23 = scalar_select %p64_p1, %s2850_s17, 1 }
  0x1c   : > { %p41_p3 = scmp.ge.s32.totalorder %s3665_s21, 2  ;;  %p66_p4 = scmp.lt.s32.totalorder %s3663_s20, 1 }
  0x1d   : > { %p3597_p5 = scmp.eq.s32.totalorder %s2858_s19, 0  ;;  %p3596_p9 = scmp.lt.s32.totalorder %s2858_s19, 6 }
  0x1e   : > { %s3667_s21 = smov (%p41_p3, %s3665_s21), 0  ;;  %s300_s29 = sand.u32 1, %s2858_s19  }
  0x1f   : > { %3613 = sst [smem:[#allocation30_spill]] %s3667_s21  ;;  %s2995_s25 = ssub.s32 %s2854_s18, %s3667_s21 }
  0x20   : > { %s67_s24 = scalar_select %p66_p4, %s3663_s20, 1 }
  0x21   : > { %p2999_p6 = por %p3597_p5, %p80_p2  ;;  %p97_p7 = scmp.eq.s32.totalorder %s2995_s25, 0 }
  0x22   : > { %s69_s27 = ssub.s32 %s65_s23, %s67_s24  ;;  %s302_s20 = sand.u32 1, %s2838_s14  }
  0x23   : > { %s70_s28 = sor.u32 %s69_s27, %s2995_s25  ;;  %s2009_s21 = sshll.u32 %s302_s20, 7 }
  0x24   : > { %p71_p8 = scmp.eq.s32.totalorder %s70_s28, 0  ;;  %s2010_s9 = sshll.u32 %s65_s23, 4 }
  0x25   : > { %s2011_s0 = sshll.u32 %s2854_s18, 5  ;;  %s304_s8 = scalar_lea.vmem [#allocation9], %s2009_s21 }
  0x26   : > { %s3008_s17 = scalar_select %p71_p8, %s2838_s14, %s73_s22  }
  0x27   : > { %s312_s15 = sadd.s32 %s2011_s0, %s2010_s9  ;;  %s315_s7 = sshll.u32 %s304_s8, 4  ;;  %s316_s7 = int_to_ptr.vmem [resolvable:$true] %s315_s7 }
  0x28   : > { %3615 = sst [smem:[#allocation31_spill]] %s3008_s17  ;;  %s2012_s6 = sshll.u32 %s312_s15, 7 }
  0x29   : > { %s3616_s2 = sld [smem:[#allocation34_spill]]  ;;  %p3019_p10 = pnand %p3596_p9, %p2999_p6 }
  0x2a   : > { %s3023_s22 = scalar_lea.sflag [#allocation10], %s300_s29  ;;  %s2609_s0 = scalar_lea.vmem %s316_s7, 2048 }
  0x2b   : > { %p2598_p11 = pneg %p3019_p10  ;;  %p2610_p12 = scmp.ne.s32.totalorder %s316_s7, %s2609_s0 }
  0x2c   : > { %s2860_s8 = smov [#allocation9]  }
  0x2d   : > { %p2612_p13 = pnand %p2610_p12, %p2598_p11  ;;  %s2614_s9 = sshll.u32 %s2860_s8, 4  ;;  %s2615_s9 = int_to_ptr.vmem [resolvable:$false] %s2614_s9 }
  0x2e   : > { %s2616_s4 = scalar_lea.vmem %s2615_s9, 4096  ;;  %p2617_p1 = scmp.lt.s32.totalorder %s316_s7, %s2615_s9 }
  0x2f   : > { %s314_s16 = scalar_lea.hbm %s3616_s2, %s2012_s6  ;;  %p2613_p0 = pneg %p2612_p13 }
  0x30   : > { %p2618_p2 = scmp.lt.s32.totalorder %s2616_s4, %s2609_s0 }
  0x32   : > { %p2619_p3 = por %p2618_p2, %p2617_p1 }
  0x34   : > { %p2620_p4 = pnand %p2619_p3, %p2613_p0 }
  0x36   : > { %2623 = shalt.err (!%p2620_p4)
}
  0x37   : > { %s2861_s6 = smov 128   ;;  %s2862_s15 = smov 8  }
  0x38   : > { %2428 = dma.hbm_to_vmem [thread:$0]  (!%p3019_p10), %s314_s16, 2048, %s316_s7, %s3023_s22, %s2861_s6, %s2861_s6, %s2862_s15  }
  0x39   : > { %s3034_s20 = sadd.s32 4294967295, %s2858_s19   ;;  %p86_p6 = scmp.ne.s32.totalorder %s2834_s13, %s2830_s12 }
  0x3a   : > { %p87_p8 = scmp.eq.s32.totalorder %s3034_s20, 0  ;;  %p112_p11 = scmp.ne.s32.totalorder %s2822_s10, %s2818_s30 }
  0x3b   : > { %p2006_p12 = scmp.ge.s32.totalorder %s2858_s19, 1  ;;  %p274_p10 = scmp.lt.s32.totalorder %s2858_s19, 7 }
  0x3c   : > { %p3044_p13 = por %p87_p8, %p86_p6  ;;  %p3051_p0 = por %p112_p11, %p87_p8 }
  0x3d   : > { %p3055_p1 = pnand %p2006_p12, %p274_p10  ;;  %s2863_s12 = smov [#allocation6]  }
  0x3e   : > { %s3618_s21 = scalar_select %p3044_p13, 1, 0 }
  0x3f   : > { %s3619_s7 = scalar_select %p3051_p0, 1, 0 }
  0x40   : > { %s286_s23 = sshll.u32 %s2863_s12, 4  ;;  %p2421_p2 = pneg %p3055_p1  ;;  %s287_s23 = int_to_ptr.vmem [resolvable:$true] %s286_s23 }
  0x41   : > { %s2118_s30 = sshll.u32 %s2854_s18, 10  ;;  %s99_s28 = sadd.s32 1, %s2826_s11 }
  0x42   : > { %p3064_p3 = pnand %p2421_p2, %p87_p8  ;;  %p106_p4 = scmp.ne.s32.totalorder %s2826_s11, %s2822_s10 }
  0x43   : > { %s3072_s29 = scalar_select %p97_p7, %s2826_s11, %s99_s28  }
  0x44   : > { %p2626_p6 = pneg %p3064_p3  ;;  %s2635_s24 = scalar_lea.vmem %s287_s23, 4096 }
  0x45   : > { %p2636_p11 = scmp.ne.s32.totalorder %s287_s23, %s2635_s24  ;;  %p2643_p9 = scmp.lt.s32.totalorder %s287_s23, %s287_s23 }
  0x46   : > { %p2644_p5 = scmp.lt.s32.totalorder %s2635_s24, %s2635_s24 }
  0x47   : > { %p2638_p12 = pnand %p2636_p11, %p2626_p6 }
  0x48   : > { %p2645_p0 = por %p2644_p5, %p2643_p9 }
  0x49   : > { %p2639_p10 = pneg %p2638_p12 }
  0x4b   : > { %p2646_p13 = pnand %p2645_p0, %p2639_p10 }
  0x4d   : > { %2649 = shalt.err (!%p2646_p13)
}
  0x4e   : > { %s3622_s1 = sld [smem:[#allocation33_spill]]  ;;  %p3623_p7 = scmp.eq.s32.totalorder %s2858_s19, 0 }
  0x4f   : > { %s327_s0 = sand.u32 1, %s2826_s11   ;;  %s3624_s3 = sld [smem:[#allocation35_spill]] }
  0x50   : > { %p108_p2 = por %p106_p4, %p3623_p7  ;;  %s2013_s8 = sshll.u32 %s327_s0, 6 }
  0x51   : > { %p3625_p5 = scmp.lt.s32.totalorder %s2858_s19, 6  ;;  %s329_s28 = scalar_lea.vmem [#allocation11], %s2013_s8 }
  0x52   : > { %s336_s24 = sshll.u32 %s329_s28, 4  ;;  %s337_s24 = int_to_ptr.vmem [resolvable:$true] %s336_s24 }
  0x53   : > { %p3096_p9 = pnand %p3625_p5, %p108_p2 }
  0x54   : > { %2424 = dma.hbm_to_vmem [thread:$0]  (!%p3064_p3), %s3622_s1, 4096, %s287_s23, [#allocation7], %s2861_s6, %s2861_s6, %s2862_s15  }
  0x55   : > { %s335_s12 = scalar_lea.hbm %s3624_s3, %s2118_s30  ;;  %p2652_p13 = pneg %p3096_p9 }
  0x56   : > { %s2663_s6 = scalar_lea.vmem %s337_s24, 1024  ;;  %s2864_s15 = smov [#allocation11]  }
  0x57   : > { %p2664_p0 = scmp.ne.s32.totalorder %s337_s24, %s2663_s6  ;;  %s2668_s23 = sshll.u32 %s2864_s15, 4  ;;  %s2669_s23 = int_to_ptr.vmem [resolvable:$false] %s2668_s23 }
  0x58   : > { %s2670_s25 = scalar_lea.vmem %s2669_s23, 2048  ;;  %p2671_p6 = scmp.lt.s32.totalorder %s337_s24, %s2669_s23 }
  0x59   : > { %p2666_p3 = pnand %p2664_p0, %p2652_p13  ;;  %p2672_p11 = scmp.lt.s32.totalorder %s2670_s25, %s2663_s6 }
  0x5b   : > { %p2667_p4 = pneg %p2666_p3  ;;  %p2673_p12 = por %p2672_p11, %p2671_p6 }
  0x5d   : > { %p2674_p10 = pnand %p2673_p12, %p2667_p4 }
  0x5f   : > { %2677 = shalt.err (!%p2674_p10)
}
  0x60   : > { %s2865_s27 = smov 64   ;;  %s2866_s9 = smov 4  }
  0x61   : > { %2431 = dma.hbm_to_vmem [thread:$0]  (!%p3096_p9), %s335_s12, 1024, %s337_s24, %s3023_s22, %s2865_s27, %s2865_s27, %s2866_s9  }
  0x62   : > { %s362_s15 = scalar_lea.hbm %s3586_s5, %s2118_s30  ;;  %s356_s1 = scalar_lea.vmem [#allocation12], %s2013_s8 }
  0x63   : > { %s363_s2 = sshll.u32 %s356_s1, 4  ;;  %s353_s6 = scalar_lea.sflag [#allocation13], %s327_s0  ;;  %s364_s2 = int_to_ptr.vmem [resolvable:$true] %s363_s2 }
  0x64   : > { %s2691_s23 = scalar_lea.vmem %s364_s2, 1024  ;;  %s2867_s25 = smov [#allocation12]  }
  0x65   : > { %p2692_p7 = scmp.ne.s32.totalorder %s364_s2, %s2691_s23  ;;  %s2696_s3 = sshll.u32 %s2867_s25, 4  ;;  %s2697_s3 = int_to_ptr.vmem [resolvable:$false] %s2696_s3 }
  0x66   : > { %s2698_s17 = scalar_lea.vmem %s2697_s3, 2048  ;;  %p2699_p0 = scmp.lt.s32.totalorder %s364_s2, %s2697_s3 }
  0x67   : > { %p2694_p2 = pnand %p2692_p7, %p2652_p13  ;;  %p2700_p3 = scmp.lt.s32.totalorder %s2698_s17, %s2691_s23 }
  0x69   : > { %p2695_p5 = pneg %p2694_p2  ;;  %p2701_p4 = por %p2700_p3, %p2699_p0 }
  0x6b   : > { %p2702_p6 = pnand %p2701_p4, %p2695_p5 }
  0x6d   : > { %2705 = shalt.err (!%p2702_p6)
}
  0x6e   : > { %2434 = dma.hbm_to_vmem [thread:$0]  (!%p3096_p9), %s362_s15, 1024, %s364_s2, %s353_s6, %s2865_s27, %s2865_s27, %s2866_s9  }
  0x6f   : > { %393 = sbr.rel (%p3055_p1) target bundleno = 1122 (0x462), region = 52 }
  0x74   : > { %2795 = dma.done.wait (%p87_p8), [#allocation7], 4096  }
  0x75   : > { %2797 = vsyncadd (%p87_p8), [#allocation7], 4294963200  ;;  %s399_s1 = sand.u32 1, %s3034_s20   ;;  %s401_s3 = sand.u32 1, %s2834_s13  }
  0x76   : > { %s2021_s17 = sshll.u32 %s401_s3, 7  ;;  %s400_s22 = scalar_lea.sflag [#allocation10], %s399_s1 }
  0x77   : > { %s3126_s30 = scalar_lea.vmem [#allocation9], %s2021_s17  ;;  %p3627_p13 = scmp.ne.s32.totalorder %s3618_s21, 0 }
  0x79   : > { %2799 = dma.done.wait (%p3627_p13), %s400_s22, 2048  }
  0x7a   : > { %2801 = vsyncadd (%p3627_p13), %s400_s22, 4294965248  ;;  %s410_s2 = sand.u32 1, %s2822_s10   ;;  %p3628_p8 = scmp.ne.s32.totalorder %s3619_s7, 0 }
  0x7b   : > { %s2022_s16 = sshll.u32 %s410_s2, 6 }
  0x7c   : > { %s3133_s0 = scalar_lea.vmem [#allocation11], %s2022_s16 }
  0x7d   : > { %2803 = dma.done.wait (%p3628_p8), %s400_s22, 1024  }
  0x7e   : > { %2805 = vsyncadd (%p3628_p8), %s400_s22, 4294966272  ;;  %s418_s8 = scalar_lea.sflag [#allocation13], %s410_s2  ;;  %s3139_s12 = scalar_lea.vmem [#allocation12], %s2022_s16 }
  0x7f   : > { %2807 = dma.done.wait (%p3628_p8), %s418_s8, 1024  }
  0x80   : > { %2809 = vsyncadd (%p3628_p8), %s418_s8, 4294966272  ;;  %s3629_s21 = sld [smem:[#allocation27_spill]] }
  0x81   : > { %s3630_s27 = sld [smem:[#allocation36_spill]] }
  0x82   : > { %s3631_s15 = sld [smem:[#allocation37_spill]] }
  0x83   : > { %s3632_s25 = sld [smem:[#allocation38_spill]] }
  0x84   : > { %s3633_s22 = sld [smem:[#allocation39_spill]] }
  0x85   : > { %s3634_s16 = sld [smem:[#allocation26_spill]] }
  0x86   : > { %p474_p1 = scmp.lt.s32.totalorder %s3629_s21, 1 }
  0x88   : > { %s3669_s21 = smov (!%p474_p1, %s3629_s21), 1 }
  0x89   : > { %s476_s9 = scalar_lea.vmem %s3630_s27, %s3669_s21  ;;  %s479_s6 = scalar_lea.vmem %s3631_s15, %s3669_s21 }
  0x8a   : > { %s482_s1 = scalar_lea.vmem %s3632_s25, %s3669_s21  ;;  %s485_s2 = scalar_lea.vmem %s3633_s22, %s3669_s21 }
  0x8b   : > { %p2024_p9 = scmp.ge.s32.totalorder %s3634_s16, 2 }
  0x8c   : > { %s3635_s8 = sld [smem:[#allocation27_spill]] (!%p2024_p9) }
  0x8d   : > { %490 = sbr.rel (%p2024_p9) target bundleno = 1017 (0x3f9), region = 72  ;;  %s3636_s26 = sld [smem:[#allocation26_spill]] (!%p2024_p9) }
  0x92   : > { %p491_p11 = scmp.eq.s32.totalorder %s3635_s8, 0 }
  0x93   : > { %p492_p12 = scmp.eq.s32.totalorder %s3636_s26, 0 }
  0x95   : > { %p493_p10 = pnand %p492_p12, %p491_p11 }
  0x97   : > { %496 = sbr.rel (%p493_p10) target bundleno = 175 (0xaf), region = 76 }
  0x9c   : > { %s2868_s24 = smov [#allocation2]  }
  0x9d   : > { %s504_s27 = sshll.u32 %s2868_s24, 4  ;;  %s505_s27 = int_to_ptr.vmem [resolvable:$true] %s504_s27 }
  0x9e   : > { %s2714_s4 = scalar_lea.vmem %s505_s27, 2048  ;;  %p2719_p2 = scmp.lt.s32.totalorder %s505_s27, %s505_s27 }
  0x9f   : > { %p2715_p7 = scmp.ne.s32.totalorder %s505_s27, %s2714_s4  ;;  %p2720_p5 = scmp.lt.s32.totalorder %s2714_s4, %s2714_s4 }
  0xa1   : > { %p2721_p0 = por %p2720_p5, %p2719_p2 }
  0xa3   : > { %p2722_p3 = pnand %p2721_p0, %p2715_p7 }
  0xa5   : > { %2725 = shalt.err (!%p2722_p3)  }
  0xa6   : > { %s3637_s23 = sld [smem:[#allocation32_spill]] }
  0xac   : > { %507 = dma.hbm_to_vmem [thread:$0]  %s3637_s23, 2048, %s505_s27, [#allocation15] }
  0xad   : > { %2810 = dma.done.wait [#allocation15], 2048 }
  0xae   : > { %2811 = vsyncadd [#allocation15], 4294965248 }
  0xaf PF: > { %s3638_s7 = sld [smem:[#allocation26_spill]] }
  0xb5   : > { %p2025_p4 = scmp.ne.s32.totalorder %s3638_s7, 0 }
  0xb7   : > { %514 = sbr.rel (%p2025_p4) target bundleno = 190 (0xbe), region = 85 }
  0xbc   : > { %v2869_v0 = vmov 0.0  }
  0xbd   : > { %515 = vst [vmem:[#allocation4] sm:$0x1] %v2869_v0  ;;  %516 = vst [vmem:[#allocation5] sm:$0x1] %v2869_v0 }
  0xbe PF: > { %v2538_v1 = vld [vmem:[#allocation2 + $0x78] sm:$0xff]   ;;  %s3639_s25 = sld [smem:[#allocation26_spill]]  ;;  %v2540_v3 = vld [vmem:[#allocation2 + $0x70] sm:$0xff]   ;;  %v2542_v5 = vld [vmem:[#allocation2 + $0x68] sm:$0xff]  }
  0xbf   : > { %v2539_v2 = vld [vmem:[#allocation2 + $0x38] sm:$0xff]   ;;  %2247 = vmatprep.subr.bf16.mxu0 %v2538_v1  ;;  %v2541_v4 = vld [vmem:[#allocation2 + $0x30] sm:$0xff]   ;;  %v2543_v6 = vld [vmem:[#allocation2 + $0x28] sm:$0xff]  }
  0xc0   : > { %2248 = vmatpush3.bf16.msra.mxu0 %v2539_v2  ;;  %v2544_v7 = vld [vmem:[#allocation2 + $0x60] sm:$0xff]   ;;  %v2546_v9 = vld [vmem:[#allocation2 + $0x58] sm:$0xff]   ;;  %v2548_v11 = vld [vmem:[#allocation2 + $0x50] sm:$0xff]  }
  0xc1   : > { %2249 = vmatprep.subr.bf16.mxu0 %v2540_v3  ;;  %v2545_v8 = vld [vmem:[#allocation2 + $0x20] sm:$0xff]   ;;  %v2547_v10 = vld [vmem:[#allocation2 + $0x18] sm:$0xff]   ;;  %v2549_v13 = vld [vmem:[#allocation2 + $0x10] sm:$0xff]  }
  0xc2   : > { %v2550_v14 = vld [vmem:[#allocation2 + $0x48] sm:$0xff]   ;;  %v2552_v16 = vld [vmem:[#allocation2 + $0x40] sm:$0xff]   ;;  %v2579_v20 = vld [vmem:[%s3133_s0 + $0x30] sm:$0xff]  }
  0xc3   : > { %v2551_v15 = vld [vmem:[#allocation2 + $0x8] sm:$0xff]   ;;  %v2553_v17 = vld [vmem:[#allocation2] sm:$0xff]   ;;  %v2583_v38 = vld [vmem:[%s3133_s0 + $0x10] sm:$0xff]  }
  0xc4   : > { %2250 = vmatpush3.bf16.msra.mxu0 %v2541_v4  ;;  %s3173_s3 = sshll.u32 %s3639_s25, 7  ;;  %v2578_v18 = vld [vmem:[%s3133_s0 + $0x38] sm:$0xff]   ;;  %v2580_v22 = vld [vmem:[%s3133_s0 + $0x28] sm:$0xff]   ;;  %v2581_v36 = vld [vmem:[%s3133_s0 + $0x20] sm:$0xff]   ;;  %p2079_p6 = scmp.ne.s32.totalorder %s3639_s25, 1 }
  0xc5   : > { %2251 = vmatprep.subr.bf16.mxu0 %v2542_v5  ;;  %s3176_s17 = scalar_lea.vmem [#allocation6], %s3173_s3  ;;  %2343 = vmatprep.subr.bf16.mxu1 %v2578_v18  ;;  %v2582_v37 = vld [vmem:[%s3133_s0 + $0x18] sm:$0xff]   ;;  %v2584_v39 = vld [vmem:[%s3133_s0 + $0x8] sm:$0xff]   ;;  %v2585_v40 = vld [vmem:[%s3133_s0] sm:$0xff]  }
  0xc6   : > { %v2556_v12 = vld [vmem:[%s3176_s17 + $0x4] ss:$8 sps:$4 sm:$0xff]   ;;  %v2554_v19 = vld [vmem:[%s3176_s17] ss:$8 sps:$4 sm:$0xff]   ;;  %v2557_v21 = vld [vmem:[%s3176_s17 + $0x14] ss:$8 sps:$4 sm:$0xff]   ;;  %2344 = vmatpush3.bf16.msra.mxu1 %v2578_v18 }
  0xc7   : > { %795 = vmatprep.mubr.bf16.mxu0 %v2556_v12  ;;  %2345 = vmatprep.subr.bf16.mxu1 %v2579_v20  ;;  %v2559_v23 = vld [vmem:[%s3176_s17 + $0x10] ss:$8 sps:$4 sm:$0xff]   ;;  %v2560_v24 = vld [vmem:[%s3176_s17 + $0x24] ss:$8 sps:$4 sm:$0xff]   ;;  %v2562_v25 = vld [vmem:[%s3176_s17 + $0x20] ss:$8 sps:$4 sm:$0xff]  }
  0xc8   : > { %2252 = vmatpush3.bf16.msra.mxu0 %v2543_v6  ;;  %v2563_v26 = vld [vmem:[%s3176_s17 + $0x34] ss:$8 sps:$4 sm:$0xff]   ;;  %v2565_v27 = vld [vmem:[%s3176_s17 + $0x30] ss:$8 sps:$4 sm:$0xff]   ;;  %v2566_v28 = vld [vmem:[%s3176_s17 + $0x44] ss:$8 sps:$4 sm:$0xff]  }
  0xc9   : > { %2253 = vmatprep.subr.bf16.mxu0 %v2544_v7  ;;  %v2568_v29 = vld [vmem:[%s3176_s17 + $0x40] ss:$8 sps:$4 sm:$0xff]   ;;  %v2569_v30 = vld [vmem:[%s3176_s17 + $0x54] ss:$8 sps:$4 sm:$0xff]   ;;  %v2571_v31 = vld [vmem:[%s3176_s17 + $0x50] ss:$8 sps:$4 sm:$0xff]  }
  0xca   : > { %2346 = vmatpush3.bf16.msra.mxu1 %v2579_v20  ;;  %v2572_v32 = vld [vmem:[%s3176_s17 + $0x64] ss:$8 sps:$4 sm:$0xff]   ;;  %v2574_v33 = vld [vmem:[%s3176_s17 + $0x60] ss:$8 sps:$4 sm:$0xff]   ;;  %v2575_v34 = vld [vmem:[%s3176_s17 + $0x74] ss:$8 sps:$4 sm:$0xff]  }
  0xcb   : > { %2347 = vmatprep.subr.bf16.mxu1 %v2580_v22  ;;  %v2577_v35 = vld [vmem:[%s3176_s17 + $0x70] ss:$8 sps:$4 sm:$0xff]   ;;  %v571_v47 = vld [vmem:[%s3126_s30] sm:$0xff] }
  0xcc   : > { %2254 = vmatpush3.bf16.msra.mxu0 %v2545_v8  ;;  %v2586_v41 = vld [vmem:[%s3139_s12 + $0x38] sm:$0xff]   ;;  %v572_v48 = vld [vmem:[%s3126_s30 + $0x8] sm:$0xff]  ;;  %v573_v57 = vld [vmem:[%s3126_s30 + $0x10] sm:$0xff] }
  0xcd   : > { %2255 = vmatprep.subr.bf16.mxu0 %v2546_v9  ;;  %v574_v58 = vld [vmem:[%s3126_s30 + $0x18] sm:$0xff]  ;;  %v2587_v2 = vld [vmem:[%s3139_s12 + $0x30] sm:$0xff]   ;;  %v575_v5 = vld [vmem:[%s3126_s30 + $0x20] sm:$0xff] }
  0xce   : > { %2348 = vmatpush3.bf16.msra.mxu1 %v2580_v22  ;;  %v576_v6 = vld [vmem:[%s3126_s30 + $0x28] sm:$0xff]  ;;  %v577_v18 = vld [vmem:[%s3126_s30 + $0x30] sm:$0xff]  ;;  %v2590_v22 = vld [vmem:[%s3139_s12 + $0x18] sm:$0xff]  }
  0xcf   : > { %2349 = vmatprep.subr.bf16.mxu1 %v2581_v36  ;;  %v2588_v9 = vld [vmem:[%s3139_s12 + $0x28] sm:$0xff]  }
  0xd0   : > { %2256 = vmatpush3.bf16.msra.mxu0 %v2547_v10 }
  0xd1   : > { %2257 = vmatprep.subr.bf16.mxu0 %v2548_v11 }
  0xd2   : > { %2350 = vmatpush3.bf16.msra.mxu1 %v2581_v36 }
  0xd3   : > { %2351 = vmatprep.subr.bf16.mxu1 %v2582_v37 }
  0xd4   : > { %2258 = vmatpush3.bf16.msra.mxu0 %v2549_v13 }
  0xd5   : > { %2259 = vmatprep.subr.bf16.mxu0 %v2550_v14 }
  0xd6   : > { %2352 = vmatpush3.bf16.msra.mxu1 %v2582_v37 }
  0xd7   : > { %2353 = vmatprep.subr.bf16.mxu1 %v2583_v38 }
  0xd8   : > { %2260 = vmatpush3.bf16.msra.mxu0 %v2551_v15  ;;  %v2589_v15 = vld [vmem:[%s3139_s12 + $0x20] sm:$0xff]  }
  0xd9   : > { %2261 = vmatprep.subr.bf16.mxu0 %v2552_v16 }
  0xda   : > { %2354 = vmatpush3.bf16.msra.mxu1 %v2583_v38 }
  0xdb   : > { %2355 = vmatprep.subr.bf16.mxu1 %v2584_v39 }
  0xdc   : > { %2262 = vmatpush3.bf16.msra.mxu0 %v2553_v17 }
  0xde   : > { %2356 = vmatpush3.bf16.msra.mxu1 %v2584_v39 }
  0xdf   : > { %796 = vmatmul.mubr.bf16.vlgmr.msra.gmra.mxu0 %v2554_v19  ;;  %2357 = vmatprep.subr.bf16.mxu1 %v2585_v40  ;;  %v578_v19 = vld [vmem:[%s3126_s30 + $0x38] sm:$0xff] }
  0xe0   : > { %803 = vmatprep.mubr.bf16.mxu0 %v2557_v21 }
  0xe2   : > { %2358 = vmatpush3.bf16.msra.mxu1 %v2585_v40 }
  0xe3   : > { %2375 = vmatprep.subr.bf16.mxu1 %v2586_v41 }
  0xe7   : > { %804 = vmatmul.mubr.bf16.gmra.mxu0 %v2559_v23 }
  0xe8   : > { %811 = vmatprep.mubr.bf16.mxu0 %v2560_v24 }
  0xef   : > { %812 = vmatmul.mubr.bf16.gmra.mxu0 %v2562_v25 }
  0xf0   : > { %819 = vmatprep.mubr.bf16.mxu0 %v2563_v26 }
  0xf7   : > { %820 = vmatmul.mubr.bf16.gmra.mxu0 %v2565_v27 }
  0xf8   : > { %827 = vmatprep.mubr.bf16.mxu0 %v2566_v28 }
  0xff   : > { %828 = vmatmul.mubr.bf16.gmra.mxu0 %v2568_v29 }
 0x100   : > { %835 = vmatprep.mubr.bf16.mxu0 %v2569_v30  ;;  %v579_v30 = vld [vmem:[%s3126_s30 + $0x40] sm:$0xff] }
 0x107   : > { %836 = vmatmul.mubr.bf16.gmra.mxu0 %v2571_v31  ;;  %v580_v31 = vld [vmem:[%s3126_s30 + $0x48] sm:$0xff] }
 0x108   : > { %843 = vmatprep.mubr.bf16.mxu0 %v2572_v32 }
 0x10f   : > { %844 = vmatmul.mubr.bf16.gmra.mxu0 %v2574_v33 }
 0x110   : > { %851 = vmatprep.mubr.bf16.mxu0 %v2575_v34 }
 0x117   : > { %852 = vmatmul.mubr.bf16.gmra.mxu0 %v2577_v35 }
 0x19f   : > { %v2263_v42 = vpop.f32.mrf.mxu0 }
 0x1a1   : > { %v2264_v43 = vpop.f32.mrf.mxu0 }
 0x1a2   : > { %v2265_v45 = vadd.f32 %v2264_v43, %v2263_v42  ;;  %v582_v42 = vld [vmem:[%s3126_s30 + $0x58] sm:$0xff] }
 0x1a3   : > { %v2266_v44 = vpop.f32.mrf.mxu0 }
 0x1a4   : > { %v798_v51 = vadd.f32 %v2265_v45, %v571_v47 }
 0x1a5   : > { %v2267_v46 = vpop.f32.mrf.mxu0 }
 0x1a6   : > { %v2268_v49 = vadd.f32 %v2267_v46, %v2266_v44 }
 0x1a7   : > { %v2269_v50 = vpop.f32.mrf.mxu0 }
 0x1a8   : > { %v801_v52 = vadd.f32 %v2268_v49, %v572_v48 }
 0x1a9   : > { %v2270_v53 = vpop.f32.mrf.mxu0 }
 0x1aa   : > { %v860_v54 = vpack.c.bf16 %v801_v52, %v798_v51  ;;  %v2271_v56 = vadd.f32 %v2270_v53, %v2269_v50  ;;  %v583_v52 = vld [vmem:[%s3126_s30 + $0x60] sm:$0xff]  ;;  %v584_v53 = vld [vmem:[%s3126_s30 + $0x68] sm:$0xff] }
 0x1ab   : > { %v2272_v55 = vpop.f32.mrf.mxu0 }
 0x1ac   : > { %2359 = vmatprep.mubr.bf16.mxu1 %v860_v54  ;;  %v806_v62 = vadd.f32 %v2271_v56, %v573_v57 }
 0x1ad   : > { %v2273_v59 = vpop.f32.mrf.mxu0 }
 0x1ae   : > { %v2274_v60 = vadd.f32 %v2273_v59, %v2272_v55 }
 0x1af   : > { %v2275_v61 = vpop.f32.mrf.mxu0 }
 0x1b0   : > { %v809_v63 = vadd.f32 %v2274_v60, %v574_v58 }
 0x1b1   : > { %v2276_v0 = vpop.f32.mrf.mxu0 }
 0x1b2   : > { %v861_v1 = vpack.c.bf16 %v809_v63, %v806_v62  ;;  %v2277_v4 = vadd.f32 %v2276_v0, %v2275_v61  ;;  %v585_v63 = vld [vmem:[%s3126_s30 + $0x70] sm:$0xff]  ;;  %v586_v0 = vld [vmem:[%s3126_s30 + $0x78] sm:$0xff] }
 0x1b3   : > { %v2278_v3 = vpop.f32.mrf.mxu0 }
 0x1b4   : > { %2360 = vmatmul.mubr.bf16.vlgmr.msra.gmra.mxu1 %v861_v1  ;;  %v814_v11 = vadd.f32 %v2277_v4, %v575_v5 }
 0x1b5   : > { %v2279_v7 = vpop.f32.mrf.mxu0  ;;  %2376 = vmatpush3.bf16.msra.mxu1 %v2586_v41  ;;  %v581_v41 = vld [vmem:[%s3126_s30 + $0x50] sm:$0xff] }
 0x1b6   : > { %v2280_v8 = vadd.f32 %v2279_v7, %v2278_v3  ;;  %2377 = vmatprep.subr.bf16.mxu1 %v2587_v2  ;;  %v2592_v7 = vld [vmem:[%s3139_s12 + $0x8] sm:$0xff]  }
 0x1b7   : > { %v2281_v10 = vpop.f32.mrf.mxu0 }
 0x1b8   : > { %v817_v12 = vadd.f32 %v2280_v8, %v576_v6  ;;  %v2591_v6 = vld [vmem:[%s3139_s12 + $0x10] sm:$0xff]   ;;  %v2593_v8 = vld [vmem:[%s3139_s12] sm:$0xff]  }
 0x1b9   : > { %v2282_v13 = vpop.f32.mrf.mxu0  ;;  %2378 = vmatpush3.bf16.msra.mxu1 %v2587_v2 }
 0x1ba   : > { %v862_v14 = vpack.c.bf16 %v817_v12, %v814_v11  ;;  %2379 = vmatprep.subr.bf16.mxu1 %v2588_v9  ;;  %v2283_v17 = vadd.f32 %v2282_v13, %v2281_v10  ;;  %v2061_v11 = vld [vmem:[%s476_s9] ss:$0 sm:$0xff] }
 0x1bb   : > { %v2284_v16 = vpop.f32.mrf.mxu0 }
 0x1bc   : > { %2363 = vmatprep.mubr.bf16.mxu1 %v862_v14  ;;  %v822_v24 = vadd.f32 %v2283_v17, %v577_v18 }
 0x1bd   : > { %v2285_v20 = vpop.f32.mrf.mxu0  ;;  %2380 = vmatpush3.bf16.msra.mxu1 %v2588_v9 }
 0x1be   : > { %v2286_v21 = vadd.f32 %v2285_v20, %v2284_v16  ;;  %2381 = vmatprep.subr.bf16.mxu1 %v2589_v15 }
 0x1bf   : > { %v2287_v23 = vpop.f32.mrf.mxu0 }
 0x1c0   : > { %v825_v25 = vadd.f32 %v2286_v21, %v578_v19 }
 0x1c1   : > { %v2288_v26 = vpop.f32.mrf.mxu0  ;;  %2382 = vmatpush3.bf16.msra.mxu1 %v2589_v15 }
 0x1c2   : > { %v863_v27 = vpack.c.bf16 %v825_v25, %v822_v24  ;;  %2383 = vmatprep.subr.bf16.mxu1 %v2590_v22  ;;  %v2289_v29 = vadd.f32 %v2288_v26, %v2287_v23 }
 0x1c3   : > { %v2290_v28 = vpop.f32.mrf.mxu0 }
 0x1c4   : > { %2364 = vmatmul.mubr.bf16.gmra.mxu1 %v863_v27  ;;  %v830_v35 = vadd.f32 %v2289_v29, %v579_v30 }
 0x1c5   : > { %v2291_v32 = vpop.f32.mrf.mxu0  ;;  %2384 = vmatpush3.bf16.msra.mxu1 %v2590_v22 }
 0x1c6   : > { %v2292_v33 = vadd.f32 %v2291_v32, %v2290_v28  ;;  %2385 = vmatprep.subr.bf16.mxu1 %v2591_v6 }
 0x1c7   : > { %v2293_v34 = vpop.f32.mrf.mxu0 }
 0x1c8   : > { %v833_v36 = vadd.f32 %v2292_v33, %v580_v31 }
 0x1c9   : > { %v2294_v37 = vpop.f32.mrf.mxu0  ;;  %2386 = vmatpush3.bf16.msra.mxu1 %v2591_v6 }
 0x1ca   : > { %v864_v38 = vpack.c.bf16 %v833_v36, %v830_v35  ;;  %v2295_v40 = vadd.f32 %v2294_v37, %v2293_v34  ;;  %2387 = vmatprep.subr.bf16.mxu1 %v2592_v7 }
 0x1cb   : > { %v2296_v39 = vpop.f32.mrf.mxu0 }
 0x1cc   : > { %2367 = vmatprep.mubr.bf16.mxu1 %v864_v38  ;;  %v838_v46 = vadd.f32 %v2295_v40, %v581_v41 }
 0x1cd   : > { %v2297_v43 = vpop.f32.mrf.mxu0  ;;  %2388 = vmatpush3.bf16.msra.mxu1 %v2592_v7 }
 0x1ce   : > { %v2298_v44 = vadd.f32 %v2297_v43, %v2296_v39  ;;  %2389 = vmatprep.subr.bf16.mxu1 %v2593_v8 }
 0x1cf   : > { %v2299_v45 = vpop.f32.mrf.mxu0 }
 0x1d0   : > { %v841_v47 = vadd.f32 %v2298_v44, %v582_v42 }
 0x1d1   : > { %v2300_v48 = vpop.f32.mrf.mxu0  ;;  %2390 = vmatpush3.bf16.msra.mxu1 %v2593_v8 }
 0x1d2   : > { %v865_v49 = vpack.c.bf16 %v841_v47, %v838_v46  ;;  %v2301_v51 = vadd.f32 %v2300_v48, %v2299_v45 }
 0x1d3   : > { %v2302_v50 = vpop.f32.mrf.mxu0 }
 0x1d4   : > { %2368 = vmatmul.mubr.bf16.gmra.mxu1 %v865_v49  ;;  %v846_v57 = vadd.f32 %v2301_v51, %v583_v52 }
 0x1d5   : > { %v2303_v54 = vpop.f32.mrf.mxu0 }
 0x1d6   : > { %v2304_v55 = vadd.f32 %v2303_v54, %v2302_v50 }
 0x1d7   : > { %v2305_v56 = vpop.f32.mrf.mxu0 }
 0x1d8   : > { %v849_v58 = vadd.f32 %v2304_v55, %v584_v53 }
 0x1d9   : > { %v2306_v59 = vpop.f32.mrf.mxu0 }
 0x1da   : > { %v866_v60 = vpack.c.bf16 %v849_v58, %v846_v57  ;;  %v2307_v62 = vadd.f32 %v2306_v59, %v2305_v56 }
 0x1db   : > { %v2308_v61 = vpop.f32.mrf.mxu0 }
 0x1dc   : > { %2371 = vmatprep.mubr.bf16.mxu1 %v866_v60  ;;  %v854_v3 = vadd.f32 %v2307_v62, %v585_v63 }
 0x1dd   : > { %v2309_v1 = vpop.f32.mrf.mxu0 }
 0x1de   : > { %v2310_v2 = vadd.f32 %v2309_v1, %v2308_v61 }
 0x1e0   : > { %v857_v4 = vadd.f32 %v2310_v2, %v586_v0  ;;  %v2070_v2 = vld [vmem:[%s479_s6] ss:$0 sm:$0xff] }
 0x1e2   : > { %v867_v5 = vpack.c.bf16 %v857_v4, %v854_v3 }
 0x1e4   : > { %2372 = vmatmul.mubr.bf16.gmra.mxu1 %v867_v5 }
 0x274   : > { %v2361_v9 = vpop.f32.mrf.mxu1 }
 0x275   : > { %v982_v15 = vadd.f32 %v2361_v9, %v2061_v11 }
 0x276   : > { %v973_v10 = vpop.f32.mrf.mxu1 }
 0x277   : > { %v974_v13 = vadd.f32 %v2061_v11, %v973_v10  ;;  %v1038_v21 = vmax.f32 %v982_v15, 0.0 }
 0x278   : > { %v2362_v12 = vpop.f32.mrf.mxu1 }
 0x279   : > { %v985_v14 = vadd.f32 %v2362_v12, %v2061_v11  ;;  %v1036_v19 = vmax.f32 %v974_v13, 0.0 }
 0x27a   : > { %v976_v16 = vpop.f32.mrf.mxu1 }
 0x27b   : > { %v977_v17 = vadd.f32 %v2061_v11, %v976_v16  ;;  %v1039_v18 = vmax.f32 %v985_v14, 0.0 }
 0x27d   : > { %v1037_v20 = vmax.f32 %v977_v17, 0.0  ;;  %v1053_v23 = vpack.c.bf16 %v1039_v18, %v1038_v21 }
 0x27f   : > { %v1052_v22 = vpack.c.bf16 %v1037_v20, %v1036_v19 }
 0x281   : > { %2391 = vmatprep.mubr.bf16.mxu1 %v1052_v22 }
 0x282   : > { %2392 = vmatmul.mubr.bf16.vlgmr.msra.gmra.mxu1 %v1053_v23 }
 0x284   : > { %v2365_v24 = vpop.f32.mrf.mxu1 }
 0x285   : > { %v998_v29 = vadd.f32 %v2365_v24, %v2061_v11 }
 0x286   : > { %v989_v25 = vpop.f32.mrf.mxu1 }
 0x287   : > { %v990_v27 = vadd.f32 %v2061_v11, %v989_v25  ;;  %v1042_v35 = vmax.f32 %v998_v29, 0.0 }
 0x288   : > { %v2366_v26 = vpop.f32.mrf.mxu1 }
 0x289   : > { %v1001_v28 = vadd.f32 %v2366_v26, %v2061_v11  ;;  %v1040_v33 = vmax.f32 %v990_v27, 0.0 }
 0x28a   : > { %v992_v30 = vpop.f32.mrf.mxu1 }
 0x28b   : > { %v993_v31 = vadd.f32 %v2061_v11, %v992_v30  ;;  %v1043_v32 = vmax.f32 %v1001_v28, 0.0 }
 0x28d   : > { %v1041_v34 = vmax.f32 %v993_v31, 0.0  ;;  %v1055_v37 = vpack.c.bf16 %v1043_v32, %v1042_v35 }
 0x28f   : > { %v1054_v36 = vpack.c.bf16 %v1041_v34, %v1040_v33 }
 0x291   : > { %2395 = vmatprep.mubr.bf16.mxu1 %v1054_v36 }
 0x292   : > { %2396 = vmatmul.mubr.bf16.gmra.mxu1 %v1055_v37 }
 0x294   : > { %v2369_v38 = vpop.f32.mrf.mxu1 }
 0x295   : > { %v1014_v43 = vadd.f32 %v2369_v38, %v2061_v11 }
 0x296   : > { %v1005_v39 = vpop.f32.mrf.mxu1 }
 0x297   : > { %v1006_v41 = vadd.f32 %v2061_v11, %v1005_v39  ;;  %v1046_v49 = vmax.f32 %v1014_v43, 0.0 }
 0x298   : > { %v2370_v40 = vpop.f32.mrf.mxu1 }
 0x299   : > { %v1017_v42 = vadd.f32 %v2370_v40, %v2061_v11  ;;  %v1044_v47 = vmax.f32 %v1006_v41, 0.0 }
 0x29a   : > { %v1008_v44 = vpop.f32.mrf.mxu1 }
 0x29b   : > { %v1009_v45 = vadd.f32 %v2061_v11, %v1008_v44  ;;  %v1047_v46 = vmax.f32 %v1017_v42, 0.0 }
 0x29d   : > { %v1045_v48 = vmax.f32 %v1009_v45, 0.0  ;;  %v1057_v51 = vpack.c.bf16 %v1047_v46, %v1046_v49 }
 0x29f   : > { %v1056_v50 = vpack.c.bf16 %v1045_v48, %v1044_v47 }
 0x2a1   : > { %2399 = vmatprep.mubr.bf16.mxu1 %v1056_v50 }
 0x2a2   : > { %2400 = vmatmul.mubr.bf16.gmra.mxu1 %v1057_v51 }
 0x2a4   : > { %v2373_v52 = vpop.f32.mrf.mxu1 }
 0x2a5   : > { %v1030_v57 = vadd.f32 %v2373_v52, %v2061_v11 }
 0x2a6   : > { %v1021_v53 = vpop.f32.mrf.mxu1 }
 0x2a7   : > { %v1022_v55 = vadd.f32 %v2061_v11, %v1021_v53  ;;  %v1050_v63 = vmax.f32 %v1030_v57, 0.0 }
 0x2a8   : > { %v2374_v54 = vpop.f32.mrf.mxu1 }
 0x2a9   : > { %v1033_v56 = vadd.f32 %v2374_v54, %v2061_v11  ;;  %v1048_v61 = vmax.f32 %v1022_v55, 0.0 }
 0x2aa   : > { %v1024_v58 = vpop.f32.mrf.mxu1 }
 0x2ab   : > { %v1025_v59 = vadd.f32 %v2061_v11, %v1024_v58  ;;  %v1051_v60 = vmax.f32 %v1033_v56, 0.0 }
 0x2ad   : > { %v1049_v62 = vmax.f32 %v1025_v59, 0.0  ;;  %v1059_v1 = vpack.c.bf16 %v1051_v60, %v1050_v63 }
 0x2af   : > { %v1058_v0 = vpack.c.bf16 %v1049_v62, %v1048_v61 }
 0x2b1   : > { %2403 = vmatprep.mubr.bf16.mxu1 %v1058_v0 }
 0x2b2   : > { %2404 = vmatmul.mubr.bf16.gmra.mxu1 %v1059_v1 }
 0x342   : > { %v2393_v3 = vpop.f32.mrf.mxu1 }
 0x343   : > { %v3236_v4 = vadd.f32 %v2393_v3, %v2070_v2 }
 0x344   : > { %v1165_v5 = vpop.f32.mrf.mxu1 }
 0x345   : > { %v3238_v6 = vadd.f32 %v2070_v2, %v1165_v5 }
 0x346   : > { %v2394_v7 = vpop.f32.mrf.mxu1 }
 0x347   : > { %v3240_v8 = vadd.f32 %v2394_v7, %v2070_v2 }
 0x348   : > { %v1168_v9 = vpop.f32.mrf.mxu1 }
 0x349   : > { %v3242_v10 = vadd.f32 %v2070_v2, %v1168_v9 }
 0x352   : > { %v2397_v11 = vpop.f32.mrf.mxu1 }
 0x353   : > { %v3244_v12 = vadd.f32 %v2397_v11, %v2070_v2 }
 0x354   : > { %v1181_v13 = vpop.f32.mrf.mxu1 }
 0x355   : > { %v3246_v14 = vadd.f32 %v2070_v2, %v1181_v13 }
 0x356   : > { %v2398_v15 = vpop.f32.mrf.mxu1 }
 0x357   : > { %v3248_v16 = vadd.f32 %v2398_v15, %v2070_v2 }
 0x358   : > { %v1184_v17 = vpop.f32.mrf.mxu1 }
 0x359   : > { %v3250_v18 = vadd.f32 %v2070_v2, %v1184_v17 }
 0x362   : > { %v2401_v19 = vpop.f32.mrf.mxu1 }
 0x363   : > { %v3252_v20 = vadd.f32 %v2401_v19, %v2070_v2 }
 0x364   : > { %v1197_v21 = vpop.f32.mrf.mxu1 }
 0x365   : > { %v3254_v22 = vadd.f32 %v2070_v2, %v1197_v21 }
 0x366   : > { %v2402_v23 = vpop.f32.mrf.mxu1 }
 0x367   : > { %v3256_v24 = vadd.f32 %v2402_v23, %v2070_v2 }
 0x368   : > { %v1200_v25 = vpop.f32.mrf.mxu1 }
 0x369   : > { %v3258_v26 = vadd.f32 %v2070_v2, %v1200_v25 }
 0x372   : > { %v2405_v27 = vpop.f32.mrf.mxu1 }
 0x373   : > { %v3260_v28 = vadd.f32 %v2405_v27, %v2070_v2 }
 0x374   : > { %v1213_v29 = vpop.f32.mrf.mxu1 }
 0x375   : > { %v3262_v30 = vadd.f32 %v2070_v2, %v1213_v29  ;;  %1231 = sbr.rel (%p2079_p6) target bundleno = 948 (0x3b4), region = 89 }
 0x376   : > { %v2406_v31 = vpop.f32.mrf.mxu1 }
 0x377   : > { %v3264_v32 = vadd.f32 %v2406_v31, %v2070_v2 }
 0x378   : > { %v1216_v33 = vpop.f32.mrf.mxu1 }
 0x379   : > { %v3266_v34 = vadd.f32 %v2070_v2, %v1216_v33 }
 0x37a   : > { %v1232_v35 = vlaneseq  ;;  %v3273_v38 = vstv %s3173_s3 }
 0x37c   : > { %v3269_v36 = vshrl.u32 %v1232_v35, 7 }
 0x37e   : > { %v1234_v37 = vadd.s32 8, %v3269_v36  ;;  %v1235_v39 = vadd.s32 16, %v3269_v36  ;;  %v1236_v40 = vadd.s32 24, %v3269_v36  ;;  %v1250_v41 = vadd.s32 %v3273_v38, %v3269_v36 }
 0x37f   : > { %v1237_v43 = vadd.s32 32, %v3269_v36  ;;  %v1238_v45 = vadd.s32 40, %v3269_v36  ;;  %v1239_v47 = vadd.s32 48, %v3269_v36  ;;  %v1240_v51 = vadd.s32 56, %v3269_v36 }
 0x380   : > { %v1251_v42 = vadd.s32 %v3273_v38, %v1234_v37  ;;  %v1252_v44 = vadd.s32 %v3273_v38, %v1235_v39  ;;  %v1253_v46 = vadd.s32 %v3273_v38, %v1236_v40  ;;  %vm1266_vm0 = vcmp.lt.s32.totalorder %v1250_v41, 200 }
 0x381   : > { %v1254_v48 = vadd.s32 %v3273_v38, %v1237_v43  ;;  %v1282_v49 = vsel %vm1266_vm0, %v3238_v6, 0.0  ;;  %v1255_v52 = vadd.s32 %v3273_v38, %v1238_v45  ;;  %v1241_v53 = vadd.s32 64, %v3269_v36 }
 0x382   : > { %vm1267_vm1 = vcmp.lt.s32.totalorder %v1251_v42, 200  ;;  %vm1268_vm2 = vcmp.lt.s32.totalorder %v1252_v44, 200  ;;  %vm1269_vm3 = vcmp.lt.s32.totalorder %v1253_v46, 200  ;;  %v1256_v56 = vadd.s32 %v3273_v38, %v1239_v47 }
 0x383   : > { %v1283_v50 = vsel %vm1267_vm1, %v3242_v10, 0.0  ;;  %v1284_v54 = vsel %vm1268_vm2, %v3236_v4, 0.0  ;;  %vm1270_vm4 = vcmp.lt.s32.totalorder %v1254_v48, 200  ;;  %v1323_v57 = vmul.f32 %v1282_v49, %v1282_v49 }
 0x384   : > { %v1299_v55 = vadd.f32 %v1283_v50, %v1282_v49  ;;  %v1324_v58 = vmul.f32 %v1283_v50, %v1283_v50  ;;  %v1285_v59 = vsel %vm1269_vm3, %v3240_v8, 0.0  ;;  %v1242_v61 = vadd.s32 72, %v3269_v36 }
 0x385   : > { %v1257_v62 = vadd.s32 %v3273_v38, %v1240_v51  ;;  %vm1271_vm5 = vcmp.lt.s32.totalorder %v1255_v52, 200  ;;  %v1325_v63 = vmul.f32 %v1284_v54, %v1284_v54  ;;  %v1243_v0 = vadd.s32 80, %v3269_v36 }
 0x386   : > { %v1300_v60 = vadd.f32 %v1299_v55, %v1284_v54  ;;  %v1286_v1 = vsel %vm1270_vm4, %v3246_v14, 0.0  ;;  %v1258_v3 = vadd.s32 %v3273_v38, %v1241_v53  ;;  %vm1272_vm6 = vcmp.lt.s32.totalorder %v1256_v56, 200 }
 0x387   : > { %v1326_v5 = vmul.f32 %v1285_v59, %v1285_v59  ;;  %v1339_v7 = vadd.f32 %v1324_v58, %v1323_v57  ;;  %v1244_v9 = vadd.s32 88, %v3269_v36  ;;  %v1287_v11 = vsel %vm1271_vm5, %v3250_v18, 0.0 }
 0x388   : > { %v1301_v2 = vadd.f32 %v1300_v60, %v1285_v59  ;;  %v1259_v15 = vadd.s32 %v3273_v38, %v1242_v61  ;;  %vm1273_vm7 = vcmp.lt.s32.totalorder %v1257_v62, 200  ;;  %v1327_v17 = vmul.f32 %v1286_v1, %v1286_v1 }
 0x389   : > { %v1340_v19 = vadd.f32 %v1339_v7, %v1325_v63  ;;  %v1245_v21 = vadd.s32 96, %v3269_v36  ;;  %v1288_v23 = vsel %vm1272_vm6, %v3244_v12, 0.0  ;;  %v1260_v27 = vadd.s32 %v3273_v38, %v1243_v0 }
 0x38a   : > { %v1302_v13 = vadd.f32 %v1301_v2, %v1286_v1  ;;  %vm1274_vm8 = vcmp.lt.s32.totalorder %v1258_v3, 200  ;;  %v1328_v29 = vmul.f32 %v1287_v11, %v1287_v11  ;;  %v1246_v33 = vadd.s32 104, %v3269_v36 }
 0x38b   : > { %v1341_v31 = vadd.f32 %v1340_v19, %v1326_v5  ;;  %v1289_v35 = vsel %vm1273_vm7, %v3248_v16, 0.0  ;;  %v1261_v39 = vadd.s32 %v3273_v38, %v1244_v9  ;;  %vm1275_vm9 = vcmp.lt.s32.totalorder %v1259_v15, 200 }
 0x38c   : > { %v1303_v25 = vadd.f32 %v1302_v13, %v1287_v11  ;;  %v1329_v40 = vmul.f32 %v1288_v23, %v1288_v23  ;;  %v1247_v42 = vadd.s32 112, %v3269_v36  ;;  %v1290_v43 = vsel %vm1274_vm8, %v3254_v22, 0.0 }
 0x38d   : > { %v1342_v41 = vadd.f32 %v1341_v31, %v1327_v17  ;;  %v1262_v45 = vadd.s32 %v3273_v38, %v1245_v21  ;;  %vm1276_vm10 = vcmp.lt.s32.totalorder %v1260_v27, 200  ;;  %v1330_v46 = vmul.f32 %v1289_v35, %v1289_v35 }
 0x38e   : > { %v1304_v37 = vadd.f32 %v1303_v25, %v1288_v23  ;;  %v1248_v48 = vadd.s32 120, %v3269_v36  ;;  %v1291_v49 = vsel %vm1275_vm9, %v3258_v26, 0.0  ;;  %v1263_v51 = vadd.s32 %v3273_v38, %v1246_v33 }
 0x38f   : > { %v1343_v47 = vadd.f32 %v1342_v41, %v1328_v29  ;;  %vm1277_vm11 = vcmp.lt.s32.totalorder %v1261_v39, 200  ;;  %v1331_v52 = vmul.f32 %v1290_v43, %v1290_v43  ;;  %v1292_v54 = vsel %vm1276_vm10, %v3252_v20, 0.0 }
 0x390   : > { %v1305_v44 = vadd.f32 %v1304_v37, %v1289_v35  ;;  %v1264_v56 = vadd.s32 %v3273_v38, %v1247_v42  ;;  %vm1278_vm12 = vcmp.lt.s32.totalorder %v1262_v45, 200  ;;  %v1332_v57 = vmul.f32 %v1291_v49, %v1291_v49 }
 0x391   : > { %v1344_v53 = vadd.f32 %v1343_v47, %v1329_v40  ;;  %v1293_v59 = vsel %vm1277_vm11, %v3256_v24, 0.0  ;;  %v1265_v36 = vadd.s32 %v3273_v38, %v1248_v48  ;;  %vm1279_vm13 = vcmp.lt.s32.totalorder %v1263_v51, 200 }
 0x392   : > { %v1306_v50 = vadd.f32 %v1305_v44, %v1290_v43  ;;  %v1333_v61 = vmul.f32 %v1292_v54, %v1292_v54  ;;  %v1294_v63 = vsel %vm1278_vm12, %v3262_v30, 0.0  ;;  %vm1280_vm14 = vcmp.lt.s32.totalorder %v1264_v56, 200  ;;  %v1298_v44 = vld [vmem:[#allocation4] sm:$0x1] }
 0x393   : > { %v1345_v58 = vadd.f32 %v1344_v53, %v1330_v46  ;;  %v1334_v1 = vmul.f32 %v1293_v59, %v1293_v59  ;;  %v1295_v3 = vsel %vm1279_vm13, %v3266_v34, 0.0  ;;  %vm1281_vm15 = vcmp.lt.s32.totalorder %v1265_v36, 200 }
 0x394   : > { %v1307_v55 = vadd.f32 %v1306_v50, %v1291_v49  ;;  %v1335_v7 = vmul.f32 %v1294_v63, %v1294_v63  ;;  %v1296_v11 = vsel %vm1280_vm14, %v3260_v28, 0.0  ;;  %v1336_v15 = vmul.f32 %v1295_v3, %v1295_v3  ;;  %v1322_v50 = vld [vmem:[#allocation5] sm:$0x1] }
 0x395   : > { %v1346_v62 = vadd.f32 %v1345_v58, %v1331_v52  ;;  %v1297_v17 = vsel %vm1281_vm15, %v3264_v32, 0.0  ;;  %v1337_v21 = vmul.f32 %v1296_v11, %v1296_v11 }
 0x396   : > { %v1308_v60 = vadd.f32 %v1307_v55, %v1292_v54  ;;  %v1338_v27 = vmul.f32 %v1297_v17, %v1297_v17 }
 0x397   : > { %v1347_v2 = vadd.f32 %v1346_v62, %v1332_v57 }
 0x398   : > { %v1309_v0 = vadd.f32 %v1308_v60, %v1293_v59 }
 0x399   : > { %v1348_v9 = vadd.f32 %v1347_v2, %v1333_v61 }
 0x39a   : > { %v1310_v5 = vadd.f32 %v1309_v0, %v1294_v63 }
 0x39b   : > { %v1349_v38 = vadd.f32 %v1348_v9, %v1334_v1 }
 0x39c   : > { %v1311_v13 = vadd.f32 %v1310_v5, %v1295_v3 }
 0x39d   : > { %v1350_v23 = vadd.f32 %v1349_v38, %v1335_v7 }
 0x39e   : > { %v1312_v19 = vadd.f32 %v1311_v13, %v1296_v11 }
 0x39f   : > { %v1351_v29 = vadd.f32 %v1350_v23, %v1336_v15 }
 0x3a0   : > { %v1313_v25 = vadd.f32 %v1312_v19, %v1297_v17 }
 0x3a1   : > { %v1352_v33 = vadd.f32 %v1351_v29, %v1337_v21 }
 0x3a2   : > { %v1314_v31 = vrot.slane %v1313_v25, 4 }
 0x3a3   : > { %v1353_v37 = vadd.f32 %v1352_v33, %v1338_v27 }
 0x3a4   : > { %v1315_v35 = vadd.f32 %v1314_v31, %v1313_v25 }
 0x3a5   : > { %v1354_v40 = vrot.slane %v1353_v37, 4 }
 0x3a6   : > { %v1316_v39 = vrot.slane %v1315_v35, 2 }
 0x3a7   : > { %v1355_v42 = vadd.f32 %v1354_v40, %v1353_v37 }
 0x3a8   : > { %v1317_v41 = vadd.f32 %v1316_v39, %v1315_v35 }
 0x3a9   : > { %v1356_v45 = vrot.slane %v1355_v42, 2 }
 0x3aa   : > { %v1318_v43 = vrot.slane %v1317_v41, 1 }
 0x3ab   : > { %v1357_v47 = vadd.f32 %v1356_v45, %v1355_v42 }
 0x3ac   : > { %v1319_v46 = vadd.f32 %v1318_v43, %v1317_v41 }
 0x3ad   : > { %v1358_v49 = vrot.slane %v1357_v47, 1 }
 0x3ae   : > { %v1320_v48 = vadd.f32 %v1319_v46, %v1298_v44 }
 0x3af   : > { %v1359_v51 = vadd.f32 %v1358_v49, %v1357_v47 }
 0x3b0   : > { %1321 = vst [vmem:[#allocation4] sm:$0x1] %v1320_v48 }
 0x3b1   : > { %v1360_v52 = vadd.f32 %v1359_v51, %v1322_v50 }
 0x3b3   : > { %1361 = vst [vmem:[#allocation5] sm:$0x1] %v1360_v52 }
 0x3b4 PF: > { %s3642_s6 = sld [smem:[#allocation26_spill]] }
 0x3ba   : > { %p2080_p13 = scmp.ge.s32.totalorder %s3642_s6, 1 }
 0x3bc   : > { %1365 = sbr.rel (%p2080_p13) target bundleno = 1008 (0x3f0), region = 93 }
 0x3c1   : > { %v1367_v53 = vadd.f32 %v3242_v10, %v3238_v6  ;;  %v1391_v54 = vmul.f32 %v3238_v6, %v3238_v6  ;;  %v1392_v55 = vmul.f32 %v3242_v10, %v3242_v10  ;;  %v1393_v57 = vmul.f32 %v3236_v4, %v3236_v4 }
 0x3c2   : > { %v1394_v59 = vmul.f32 %v3240_v8, %v3240_v8  ;;  %v1395_v61 = vmul.f32 %v3246_v14, %v3246_v14  ;;  %v1396_v0 = vmul.f32 %v3250_v18, %v3250_v18  ;;  %v1397_v3 = vmul.f32 %v3244_v12, %v3244_v12 }
 0x3c3   : > { %v1368_v56 = vadd.f32 %v1367_v53, %v3236_v4  ;;  %v1407_v60 = vadd.f32 %v1392_v55, %v1391_v54  ;;  %v1398_v9 = vmul.f32 %v3248_v16, %v3248_v16  ;;  %v1399_v15 = vmul.f32 %v3254_v22, %v3254_v22 }
 0x3c4   : > { %v1400_v19 = vmul.f32 %v3258_v26, %v3258_v26  ;;  %v1401_v25 = vmul.f32 %v3252_v20, %v3252_v20  ;;  %v1402_v31 = vmul.f32 %v3256_v24, %v3256_v24  ;;  %v1403_v37 = vmul.f32 %v3262_v30, %v3262_v30 }
 0x3c5   : > { %v1369_v58 = vadd.f32 %v1368_v56, %v3240_v8  ;;  %v1408_v62 = vadd.f32 %v1407_v60, %v1393_v57  ;;  %v1404_v41 = vmul.f32 %v3266_v34, %v3266_v34  ;;  %v1405_v44 = vmul.f32 %v3260_v28, %v3260_v28 }
 0x3c6   : > { %v1406_v47 = vmul.f32 %v3264_v32, %v3264_v32 }
 0x3c7   : > { %v1370_v36 = vadd.f32 %v1369_v58, %v3246_v14  ;;  %v1409_v1 = vadd.f32 %v1408_v62, %v1394_v59  ;;  %v1366_v59 = vld [vmem:[#allocation4] sm:$0x1] }
 0x3c9   : > { %v1371_v63 = vadd.f32 %v1370_v36, %v3250_v18  ;;  %v1410_v5 = vadd.f32 %v1409_v1, %v1395_v61 }
 0x3cb   : > { %v1372_v2 = vadd.f32 %v1371_v63, %v3244_v12  ;;  %v1411_v11 = vadd.f32 %v1410_v5, %v1396_v0  ;;  %v1390_v63 = vld [vmem:[#allocation5] sm:$0x1] }
 0x3cd   : > { %v1373_v7 = vadd.f32 %v1372_v2, %v3248_v16  ;;  %v1412_v38 = vadd.f32 %v1411_v11, %v1397_v3 }
 0x3cf   : > { %v1374_v13 = vadd.f32 %v1373_v7, %v3254_v22  ;;  %v1413_v21 = vadd.f32 %v1412_v38, %v1398_v9 }
 0x3d1   : > { %v1375_v17 = vadd.f32 %v1374_v13, %v3258_v26  ;;  %v1414_v27 = vadd.f32 %v1413_v21, %v1399_v15 }
 0x3d3   : > { %v1376_v23 = vadd.f32 %v1375_v17, %v3252_v20  ;;  %v1415_v33 = vadd.f32 %v1414_v27, %v1400_v19 }
 0x3d5   : > { %v1377_v29 = vadd.f32 %v1376_v23, %v3256_v24  ;;  %v1416_v39 = vadd.f32 %v1415_v33, %v1401_v25 }
 0x3d7   : > { %v1378_v35 = vadd.f32 %v1377_v29, %v3262_v30  ;;  %v1417_v42 = vadd.f32 %v1416_v39, %v1402_v31 }
 0x3d9   : > { %v1379_v40 = vadd.f32 %v1378_v35, %v3266_v34  ;;  %v1418_v45 = vadd.f32 %v1417_v42, %v1403_v37 }
 0x3db   : > { %v1380_v43 = vadd.f32 %v1379_v40, %v3260_v28  ;;  %v1419_v48 = vadd.f32 %v1418_v45, %v1404_v41 }
 0x3dd   : > { %v1381_v46 = vadd.f32 %v1380_v43, %v3264_v32  ;;  %v1420_v50 = vadd.f32 %v1419_v48, %v1405_v44 }
 0x3df   : > { %v1382_v49 = vrot.slane %v1381_v46, 4  ;;  %v1421_v52 = vadd.f32 %v1420_v50, %v1406_v47 }
 0x3e1   : > { %v1383_v51 = vadd.f32 %v1382_v49, %v1381_v46  ;;  %v1422_v54 = vrot.slane %v1421_v52, 4 }
 0x3e3   : > { %v1384_v53 = vrot.slane %v1383_v51, 2  ;;  %v1423_v56 = vadd.f32 %v1422_v54, %v1421_v52 }
 0x3e5   : > { %v1385_v55 = vadd.f32 %v1384_v53, %v1383_v51  ;;  %v1424_v58 = vrot.slane %v1423_v56, 2 }
 0x3e7   : > { %v1386_v57 = vrot.slane %v1385_v55, 1  ;;  %v1425_v36 = vadd.f32 %v1424_v58, %v1423_v56 }
 0x3e9   : > { %v1387_v60 = vadd.f32 %v1386_v57, %v1385_v55  ;;  %v1426_v62 = vrot.slane %v1425_v36, 1 }
 0x3eb   : > { %v1388_v61 = vadd.f32 %v1387_v60, %v1366_v59  ;;  %v1427_v0 = vadd.f32 %v1426_v62, %v1425_v36 }
 0x3ed   : > { %1389 = vst [vmem:[#allocation4] sm:$0x1] %v1388_v61  ;;  %v1428_v1 = vadd.f32 %v1427_v0, %v1390_v63 }
 0x3ef   : > { %1429 = vst [vmem:[#allocation5] sm:$0x1] %v1428_v1 }
 0x3f0 PF: > { %s1430_s8 = scalar_lea.vmem [#allocation3], %s3173_s3 }
 0x3f1   : > { %1431 = vst [vmem:[%s1430_s8] sm:$0xff] %v3238_v6  ;;  %1432 = vst [vmem:[%s1430_s8 + $0x8] sm:$0xff] %v3242_v10 }
 0x3f2   : > { %1433 = vst [vmem:[%s1430_s8 + $0x10] sm:$0xff] %v3236_v4  ;;  %1434 = vst [vmem:[%s1430_s8 + $0x18] sm:$0xff] %v3240_v8 }
 0x3f3   : > { %1435 = vst [vmem:[%s1430_s8 + $0x20] sm:$0xff] %v3246_v14  ;;  %1436 = vst [vmem:[%s1430_s8 + $0x28] sm:$0xff] %v3250_v18 }
 0x3f4   : > { %1437 = vst [vmem:[%s1430_s8 + $0x30] sm:$0xff] %v3244_v12  ;;  %1438 = vst [vmem:[%s1430_s8 + $0x38] sm:$0xff] %v3248_v16 }
 0x3f5   : > { %1439 = vst [vmem:[%s1430_s8 + $0x40] sm:$0xff] %v3254_v22  ;;  %1440 = vst [vmem:[%s1430_s8 + $0x48] sm:$0xff] %v3258_v26 }
 0x3f6   : > { %1441 = vst [vmem:[%s1430_s8 + $0x50] sm:$0xff] %v3252_v20  ;;  %1442 = vst [vmem:[%s1430_s8 + $0x58] sm:$0xff] %v3256_v24 }
 0x3f7   : > { %1443 = vst [vmem:[%s1430_s8 + $0x60] sm:$0xff] %v3262_v30  ;;  %1444 = vst [vmem:[%s1430_s8 + $0x68] sm:$0xff] %v3266_v34 }
 0x3f8   : > { %1445 = vst [vmem:[%s1430_s8 + $0x70] sm:$0xff] %v3260_v28  ;;  %1446 = vst [vmem:[%s1430_s8 + $0x78] sm:$0xff] %v3264_v32 }
 0x3f9 PF: > { %s3643_s26 = sld [smem:[#allocation26_spill]] }
 0x3ff   : > { %p2081_p8 = scmp.ne.s32.totalorder %s3643_s26, 2 }
 0x400   : > { %s3644_s24 = sld [smem:[#allocation27_spill]] (!%p2081_p8) }
 0x401   : > { %1450 = sbr.rel (%p2081_p8) target bundleno = 1100 (0x44c), region = 97 }
 0x406   : > { %v1451_v4 = vld [vmem:[#allocation4] sm:$0x1]  ;;  %v1453_v6 = vld [vmem:[#allocation5] sm:$0x1]  ;;  %v1483_v20 = vlaneseq  ;;  %p1465_p1 = scmp.eq.s32.totalorder %s3644_s24, 1  ;;  %v1467_v2 = vld [vmem:[#allocation3 + $0x8] sm:$0xff] }
 0x407   : > { %v1452_v8 = vmul.f32 0.005, %v1451_v4  ;;  %v1454_v10 = vmul.f32 0.005, %v1453_v6  ;;  %v1460_v24 = vld [vmem:[%s482_s1] sm:$0x1] }
 0x408   : > { %v1484_v22 = vshrl.u32 %v1483_v20, 7  ;;  %s1558_s27 = scalar_select %p1465_p1, 1, 0  ;;  %v1462_v32 = vld [vmem:[%s485_s2] sm:$0x1]  ;;  %v1468_v5 = vld [vmem:[#allocation3 + $0x10] sm:$0xff] }
 0x409   : > { %v1455_v12 = vmul.f32 %v1452_v8, %v1452_v8  ;;  %v1466_v34 = vld [vmem:[#allocation3] sm:$0xff]  ;;  %v1469_v7 = vld [vmem:[#allocation3 + $0x18] sm:$0xff]  ;;  %v1471_v15 = vld [vmem:[#allocation3 + $0x28] sm:$0xff] }
 0x40a   : > { %v1485_v26 = vsub.s32 0, %v1484_v22  ;;  %v1559_v3 = vstv %s1558_s27  ;;  %v1470_v9 = vld [vmem:[#allocation3 + $0x20] sm:$0xff]  ;;  %v1472_v38 = vld [vmem:[#allocation3 + $0x30] sm:$0xff]  ;;  %v1473_v17 = vld [vmem:[#allocation3 + $0x38] sm:$0xff] }
 0x40b   : > { %v1456_v14 = vsub.f32 %v1454_v10, %v1455_v12  ;;  %v1474_v19 = vld [vmem:[#allocation3 + $0x40] sm:$0xff]  ;;  %v1475_v21 = vld [vmem:[#allocation3 + $0x48] sm:$0xff]  ;;  %v1476_v23 = vld [vmem:[#allocation3 + $0x50] sm:$0xff]  ;;  %vm3402_vm0 = vcmp.eq.s32.totalorder %v1559_v3, 1 }
 0x40c   : > { %v1477_v35 = vld [vmem:[#allocation3 + $0x58] sm:$0xff]  ;;  %v1478_v37 = vld [vmem:[#allocation3 + $0x60] sm:$0xff]  ;;  %v1479_v39 = vld [vmem:[#allocation3 + $0x68] sm:$0xff] }
 0x40d   : > { %v1457_v16 = vmax.f32 %v1456_v14, 0.0  ;;  %v1480_v56 = vld [vmem:[#allocation3 + $0x70] sm:$0xff]  ;;  %v1481_v57 = vld [vmem:[#allocation3 + $0x78] sm:$0xff] }
 0x40f   : > { %v1458_v18 = vadd.f32 1e-05, %v1457_v16 }
 0x411   : > { %2594 = vrsqrt.f32 %v1458_v18 }
 0x41e   : > { %v2595_v28 = vpop.eup %2594 }
 0x41f   : > { %v1461_v30 = vmul.f32 %v2595_v28, %v1460_v24 }
 0x421   : > { %v1463_v11 = vmul.f32 %v1461_v30, %v1452_v8  ;;  %v3400_v13 = vrot.slane %v1461_v30, %v1485_v26 }
 0x423   : > { %v1464_v27 = vsub.f32 %v1462_v32, %v1463_v11  ;;  %v1488_v29 = vmul.f32 %v3400_v13, %v1466_v34  ;;  %v1489_v31 = vmul.f32 %v3400_v13, %v1467_v2  ;;  %v1490_v33 = vmul.f32 %v3400_v13, %v1468_v5 }
 0x424   : > { %v1491_v40 = vmul.f32 %v3400_v13, %v1469_v7  ;;  %v1492_v41 = vmul.f32 %v3400_v13, %v1470_v9  ;;  %v1493_v42 = vmul.f32 %v3400_v13, %v1471_v15  ;;  %v1494_v43 = vmul.f32 %v3400_v13, %v1472_v38 }
 0x425   : > { %v3413_v44 = vrot.slane %v1464_v27, %v1485_v26  ;;  %v1495_v45 = vmul.f32 %v3400_v13, %v1473_v17  ;;  %v1496_v46 = vmul.f32 %v3400_v13, %v1474_v19  ;;  %v1497_v47 = vmul.f32 %v3400_v13, %v1475_v21 }
 0x426   : > { %v1498_v48 = vmul.f32 %v3400_v13, %v1476_v23  ;;  %v1499_v49 = vmul.f32 %v3400_v13, %v1477_v35  ;;  %v1500_v50 = vmul.f32 %v3400_v13, %v1478_v37  ;;  %v1501_v51 = vmul.f32 %v3400_v13, %v1479_v39  ;;  %v1659_v35 = vld [vmem:[#allocation3 + $0x88] sm:$0xff] }
 0x427   : > { %v1510_v52 = vadd.f32 %v3413_v44, %v1488_v29  ;;  %v1511_v53 = vadd.f32 %v3413_v44, %v1489_v31  ;;  %v1512_v54 = vadd.f32 %v3413_v44, %v1490_v33  ;;  %v1513_v55 = vadd.f32 %v3413_v44, %v1491_v40  ;;  %v1658_v33 = vld [vmem:[#allocation3 + $0x80] sm:$0xff] }
 0x428   : > { %v1514_v58 = vadd.f32 %v3413_v44, %v1492_v41  ;;  %v1515_v59 = vadd.f32 %v3413_v44, %v1493_v42  ;;  %v1516_v60 = vadd.f32 %v3413_v44, %v1494_v43  ;;  %v1517_v36 = vadd.f32 %v3413_v44, %v1495_v45  ;;  %v1660_v42 = vld [vmem:[#allocation3 + $0x90] sm:$0xff]  ;;  %v1661_v43 = vld [vmem:[#allocation3 + $0x98] sm:$0xff]  ;;  %v1662_v45 = vld [vmem:[#allocation3 + $0xa0] sm:$0xff] }
 0x429   : > { %1526 = vst [vmem:[#allocation14] sm:$0xff] %v1510_v52  ;;  %1527 = vst [vmem:[#allocation14 + $0x8] sm:$0xff] %v1511_v53  ;;  %v1518_v61 = vadd.f32 %v3413_v44, %v1496_v46  ;;  %v1519_v62 = vadd.f32 %v3413_v44, %v1497_v47  ;;  %v1520_v63 = vadd.f32 %v3413_v44, %v1498_v48  ;;  %v1542_v10 = vmax.f32 %v1510_v52, 0.0 }
 0x42a   : > { %1528 = vst [vmem:[#allocation14 + $0x10] sm:$0xff] %v1512_v54  ;;  %1529 = vst [vmem:[#allocation14 + $0x18] sm:$0xff] %v1513_v55  ;;  %v1521_v0 = vadd.f32 %v3413_v44, %v1499_v49  ;;  %v1522_v1 = vadd.f32 %v3413_v44, %v1500_v50  ;;  %v1523_v4 = vadd.f32 %v3413_v44, %v1501_v51  ;;  %v1543_v12 = vmax.f32 %v1511_v53, 0.0  ;;  %v1663_v50 = vld [vmem:[#allocation3 + $0xa8] sm:$0xff] }
 0x42b   : > { %1530 = vst [vmem:[#allocation14 + $0x20] sm:$0xff] %v1514_v58  ;;  %1531 = vst [vmem:[#allocation14 + $0x28] sm:$0xff] %v1515_v59  ;;  %v1502_v6 = vmul.f32 %v3400_v13, %v1480_v56  ;;  %v1503_v8 = vmul.f32 %v3400_v13, %v1481_v57  ;;  %v1544_v14 = vmax.f32 %v1512_v54, 0.0  ;;  %v1545_v16 = vmax.f32 %v1513_v55, 0.0 }
 0x42c   : > { %1532 = vst [vmem:[#allocation14 + $0x30] sm:$0xff] %v1516_v60  ;;  %1533 = vst [vmem:[#allocation14 + $0x38] sm:$0xff] %v1517_v36  ;;  %v1546_v22 = vmax.f32 %v1514_v58, 0.0  ;;  %v1547_v24 = vmax.f32 %v1515_v59, 0.0  ;;  %v1561_v26 = vsel %vm3402_vm0, %v1510_v52, %v1542_v10  ;;  %v1562_v28 = vsel %vm3402_vm0, %v1511_v53, %v1543_v12 }
 0x42d   : > { %1534 = vst [vmem:[#allocation14 + $0x40] sm:$0xff] %v1518_v61  ;;  %1535 = vst [vmem:[#allocation14 + $0x48] sm:$0xff] %v1519_v62  ;;  %v1524_v18 = vadd.f32 %v3413_v44, %v1502_v6  ;;  %v1525_v20 = vadd.f32 %v3413_v44, %v1503_v8  ;;  %v1563_v30 = vsel %vm3402_vm0, %v1512_v54, %v1544_v14  ;;  %v1548_v9 = vmax.f32 %v1516_v60, 0.0  ;;  %v1669_v6 = vld [vmem:[#allocation3 + $0xd8] sm:$0xff] }
 0x42e   : > { %1536 = vst [vmem:[#allocation14 + $0x50] sm:$0xff] %v1520_v63  ;;  %1537 = vst [vmem:[#allocation14 + $0x58] sm:$0xff] %v1521_v0  ;;  %v1564_v32 = vsel %vm3402_vm0, %v1513_v55, %v1545_v16  ;;  %v2156_v34 = vpack.c.bf16 %v1562_v28, %v1561_v26  ;;  %v1565_v3 = vsel %vm3402_vm0, %v1514_v58, %v1546_v22  ;;  %v1549_v11 = vmax.f32 %v1517_v36, 0.0  ;;  %v1670_v16 = vld [vmem:[#allocation3 + $0xe0] sm:$0xff]  ;;  %v1671_v22 = vld [vmem:[#allocation3 + $0xe8] sm:$0xff] }
 0x42f   : > { %1538 = vst [vmem:[#allocation14 + $0x60] sm:$0xff] %v1522_v1  ;;  %1539 = vst [vmem:[#allocation14 + $0x68] sm:$0xff] %v1523_v4  ;;  %v2161_v2 = vpack.c.bf16 %v1564_v32, %v1563_v30  ;;  %v1566_v5 = vsel %vm3402_vm0, %v1515_v59, %v1547_v24  ;;  %v1550_v15 = vmax.f32 %v1518_v61, 0.0  ;;  %v1551_v38 = vmax.f32 %v1519_v62, 0.0  ;;  %v1664_v59 = vld [vmem:[#allocation3 + $0xb0] sm:$0xff] }
 0x430   : > { %1540 = vst [vmem:[#allocation14 + $0x70] sm:$0xff] %v1524_v18  ;;  %1541 = vst [vmem:[#allocation14 + $0x78] sm:$0xff] %v1525_v20  ;;  %v2166_v7 = vpack.c.bf16 %v1566_v5, %v1565_v3  ;;  %v1552_v17 = vmax.f32 %v1520_v63, 0.0  ;;  %v1553_v19 = vmax.f32 %v1521_v0, 0.0  ;;  %v1554_v21 = vmax.f32 %v1522_v1, 0.0  ;;  %v1673_v3 = vld [vmem:[#allocation3 + $0xf8] sm:$0xff] }
 0x431   : > { %2157 = vst [vmem:[#allocation2] sm:$0xff] %v2156_v34   ;;  %2233 = vst [vmem:[#allocation2 + $0x8] sm:$0xff] %v2161_v2   ;;  %v1567_v23 = vsel %vm3402_vm0, %v1516_v60, %v1548_v9  ;;  %v1568_v27 = vsel %vm3402_vm0, %v1517_v36, %v1549_v11  ;;  %v1569_v29 = vsel %vm3402_vm0, %v1518_v61, %v1550_v15  ;;  %v1555_v31 = vmax.f32 %v1523_v4, 0.0  ;;  %v1665_v60 = vld [vmem:[#allocation3 + $0xb8] sm:$0xff]  ;;  %v1666_v36 = vld [vmem:[#allocation3 + $0xc0] sm:$0xff] }
 0x432   : > { %2234 = vst [vmem:[#allocation2 + $0x10] sm:$0xff] %v2166_v7   ;;  %v2171_v37 = vpack.c.bf16 %v1568_v27, %v1567_v23  ;;  %v1570_v39 = vsel %vm3402_vm0, %v1519_v62, %v1551_v38  ;;  %v1571_v40 = vsel %vm3402_vm0, %v1520_v63, %v1552_v17  ;;  %v1572_v41 = vsel %vm3402_vm0, %v1521_v0, %v1553_v19  ;;  %v1672_v2 = vld [vmem:[#allocation3 + $0xf0] sm:$0xff] }
 0x433   : > { %v2176_v46 = vpack.c.bf16 %v1570_v39, %v1569_v29  ;;  %v2181_v47 = vpack.c.bf16 %v1572_v41, %v1571_v40  ;;  %v1573_v48 = vsel %vm3402_vm0, %v1522_v1, %v1554_v21  ;;  %v1574_v49 = vsel %vm3402_vm0, %v1523_v4, %v1555_v31  ;;  %v1667_v1 = vld [vmem:[#allocation3 + $0xc8] sm:$0xff]  ;;  %v1668_v4 = vld [vmem:[#allocation3 + $0xd0] sm:$0xff] }
 0x434   : > { %2235 = vst [vmem:[#allocation2 + $0x18] sm:$0xff] %v2171_v37   ;;  %v2186_v51 = vpack.c.bf16 %v1574_v49, %v1573_v48  ;;  %v1556_v52 = vmax.f32 %v1524_v18, 0.0  ;;  %v1557_v53 = vmax.f32 %v1525_v20, 0.0  ;;  %v1674_v54 = vmul.f32 %v1658_v33, %v3400_v13 }
 0x435   : > { %2236 = vst [vmem:[#allocation2 + $0x20] sm:$0xff] %v2176_v46   ;;  %2237 = vst [vmem:[#allocation2 + $0x28] sm:$0xff] %v2181_v47   ;;  %v1675_v55 = vmul.f32 %v1659_v35, %v3400_v13  ;;  %v1676_v56 = vmul.f32 %v1660_v42, %v3400_v13  ;;  %v1677_v57 = vmul.f32 %v1661_v43, %v3400_v13 }
 0x436   : > { %v1678_v58 = vmul.f32 %v1662_v45, %v3400_v13  ;;  %2238 = vst [vmem:[#allocation2 + $0x30] sm:$0xff] %v2186_v51   ;;  %v1575_v61 = vsel %vm3402_vm0, %v1524_v18, %v1556_v52  ;;  %v1576_v62 = vsel %vm3402_vm0, %v1525_v20, %v1557_v53  ;;  %v1690_v63 = vadd.f32 %v1674_v54, %v3413_v44 }
 0x437   : > { %v1679_v0 = vmul.f32 %v1663_v50, %v3400_v13  ;;  %v2191_v8 = vpack.c.bf16 %v1576_v62, %v1575_v61  ;;  %v1691_v10 = vadd.f32 %v1675_v55, %v3413_v44  ;;  %v1692_v12 = vadd.f32 %v1676_v56, %v3413_v44 }
 0x438   : > { %v1693_v14 = vadd.f32 %v1677_v57, %v3413_v44  ;;  %1707 = vst [vmem:[#allocation14 + $0x80] sm:$0xff] %v1690_v63  ;;  %v1694_v18 = vadd.f32 %v1678_v58, %v3413_v44  ;;  %v1680_v24 = vmul.f32 %v1664_v59, %v3400_v13  ;;  %v1681_v26 = vmul.f32 %v1665_v60, %v3400_v13 }
 0x439   : > { %v1695_v20 = vadd.f32 %v1679_v0, %v3413_v44  ;;  %2239 = vst [vmem:[#allocation2 + $0x38] sm:$0xff] %v2191_v8   ;;  %1708 = vst [vmem:[#allocation14 + $0x88] sm:$0xff] %v1691_v10  ;;  %v1682_v28 = vmul.f32 %v1666_v36, %v3400_v13  ;;  %v1683_v30 = vmul.f32 %v1667_v1, %v3400_v13  ;;  %v1723_v31 = vmax.f32 %v1690_v63, 0.0 }
 0x43a   : > { %1709 = vst [vmem:[#allocation14 + $0x90] sm:$0xff] %v1692_v12  ;;  %1710 = vst [vmem:[#allocation14 + $0x98] sm:$0xff] %v1693_v14  ;;  %v1684_v32 = vmul.f32 %v1668_v4, %v3400_v13  ;;  %v1685_v34 = vmul.f32 %v1669_v6, %v3400_v13  ;;  %v1696_v5 = vadd.f32 %v1680_v24, %v3413_v44  ;;  %v1724_v33 = vmax.f32 %v1691_v10, 0.0 }
 0x43b   : > { %1711 = vst [vmem:[#allocation14 + $0xa0] sm:$0xff] %v1694_v18  ;;  %1712 = vst [vmem:[#allocation14 + $0xa8] sm:$0xff] %v1695_v20  ;;  %v1697_v7 = vadd.f32 %v1681_v26, %v3413_v44  ;;  %v1686_v9 = vmul.f32 %v1670_v16, %v3400_v13  ;;  %v1687_v11 = vmul.f32 %v1671_v22, %v3400_v13  ;;  %v1725_v35 = vmax.f32 %v1692_v12, 0.0 }
 0x43c   : > { %v1698_v15 = vadd.f32 %v1682_v28, %v3413_v44  ;;  %v1699_v38 = vadd.f32 %v1683_v30, %v3413_v44  ;;  %v1700_v17 = vadd.f32 %v1684_v32, %v3413_v44  ;;  %v1701_v19 = vadd.f32 %v1685_v34, %v3413_v44  ;;  %1713 = vst [vmem:[#allocation14 + $0xb0] sm:$0xff] %v1696_v5 }
 0x43d   : > { %1714 = vst [vmem:[#allocation14 + $0xb8] sm:$0xff] %v1697_v7  ;;  %v1702_v21 = vadd.f32 %v1686_v9, %v3413_v44  ;;  %v1703_v23 = vadd.f32 %v1687_v11, %v3413_v44  ;;  %v1688_v27 = vmul.f32 %v1672_v2, %v3400_v13  ;;  %v1689_v29 = vmul.f32 %v1673_v3, %v3400_v13 }
 0x43e   : > { %1715 = vst [vmem:[#allocation14 + $0xc0] sm:$0xff] %v1698_v15  ;;  %1716 = vst [vmem:[#allocation14 + $0xc8] sm:$0xff] %v1699_v38  ;;  %v1726_v37 = vmax.f32 %v1693_v14, 0.0  ;;  %v1727_v41 = vmax.f32 %v1694_v18, 0.0  ;;  %v1728_v42 = vmax.f32 %v1695_v20, 0.0  ;;  %v1739_v43 = vsel %vm3402_vm0, %v1690_v63, %v1723_v31 }
 0x43f   : > { %1717 = vst [vmem:[#allocation14 + $0xd0] sm:$0xff] %v1700_v17  ;;  %1718 = vst [vmem:[#allocation14 + $0xd8] sm:$0xff] %v1701_v19  ;;  %v1704_v39 = vadd.f32 %v1688_v27, %v3413_v44  ;;  %v1705_v40 = vadd.f32 %v1689_v29, %v3413_v44  ;;  %v1740_v13 = vsel %vm3402_vm0, %v1691_v10, %v1724_v33  ;;  %v1729_v51 = vmax.f32 %v1696_v5, 0.0 }
 0x440   : > { %1719 = vst [vmem:[#allocation14 + $0xe0] sm:$0xff] %v1702_v21  ;;  %1720 = vst [vmem:[#allocation14 + $0xe8] sm:$0xff] %v1703_v23  ;;  %v1741_v45 = vsel %vm3402_vm0, %v1692_v12, %v1725_v35  ;;  %v1742_v46 = vsel %vm3402_vm0, %v1693_v14, %v1726_v37  ;;  %v2196_v47 = vpack.c.bf16 %v1740_v13, %v1739_v43  ;;  %v1730_v52 = vmax.f32 %v1697_v7, 0.0 }
 0x441   : > { %1721 = vst [vmem:[#allocation14 + $0xf0] sm:$0xff] %v1704_v39  ;;  %1722 = vst [vmem:[#allocation14 + $0xf8] sm:$0xff] %v1705_v40  ;;  %v2201_v48 = vpack.c.bf16 %v1742_v46, %v1741_v45  ;;  %v1743_v44 = vsel %vm3402_vm0, %v1694_v18, %v1727_v41  ;;  %v1744_v49 = vsel %vm3402_vm0, %v1695_v20, %v1728_v42  ;;  %v1731_v53 = vmax.f32 %v1698_v15, 0.0 }
 0x442   : > { %v2206_v50 = vpack.c.bf16 %v1744_v49, %v1743_v44  ;;  %2197 = vst [vmem:[#allocation2 + $0x40] sm:$0xff] %v2196_v47   ;;  %v1732_v54 = vmax.f32 %v1699_v38, 0.0  ;;  %v1733_v55 = vmax.f32 %v1700_v17, 0.0  ;;  %v1734_v56 = vmax.f32 %v1701_v19, 0.0 }
 0x443   : > { %2240 = vst [vmem:[#allocation2 + $0x48] sm:$0xff] %v2201_v48   ;;  %v1735_v57 = vmax.f32 %v1702_v21, 0.0  ;;  %v1745_v58 = vsel %vm3402_vm0, %v1696_v5, %v1729_v51  ;;  %v1746_v59 = vsel %vm3402_vm0, %v1697_v7, %v1730_v52  ;;  %v1747_v60 = vsel %vm3402_vm0, %v1698_v15, %v1731_v53 }
 0x444   : > { %2241 = vst [vmem:[#allocation2 + $0x50] sm:$0xff] %v2206_v50   ;;  %v1736_v36 = vmax.f32 %v1703_v23, 0.0  ;;  %v2211_v61 = vpack.c.bf16 %v1746_v59, %v1745_v58  ;;  %v1748_v62 = vsel %vm3402_vm0, %v1699_v38, %v1732_v54  ;;  %v1749_v63 = vsel %vm3402_vm0, %v1700_v17, %v1733_v55 }
 0x445   : > { %v1750_v0 = vsel %vm3402_vm0, %v1701_v19, %v1734_v56  ;;  %v2216_v1 = vpack.c.bf16 %v1748_v62, %v1747_v60  ;;  %v1751_v6 = vsel %vm3402_vm0, %v1702_v21, %v1735_v57  ;;  %v1737_v12 = vmax.f32 %v1704_v39, 0.0 }
 0x446   : > { %v2221_v4 = vpack.c.bf16 %v1750_v0, %v1749_v63  ;;  %v1752_v8 = vsel %vm3402_vm0, %v1703_v23, %v1736_v36  ;;  %2242 = vst [vmem:[#allocation2 + $0x58] sm:$0xff] %v2211_v61   ;;  %v1738_v14 = vmax.f32 %v1705_v40, 0.0 }
 0x447   : > { %v2226_v10 = vpack.c.bf16 %v1752_v8, %v1751_v6  ;;  %2243 = vst [vmem:[#allocation2 + $0x60] sm:$0xff] %v2216_v1   ;;  %v1753_v16 = vsel %vm3402_vm0, %v1704_v39, %v1737_v12 }
 0x448   : > { %2244 = vst [vmem:[#allocation2 + $0x68] sm:$0xff] %v2221_v4   ;;  %v1754_v22 = vsel %vm3402_vm0, %v1705_v40, %v1738_v14 }
 0x449   : > { %2245 = vst [vmem:[#allocation2 + $0x70] sm:$0xff] %v2226_v10   ;;  %v2231_v18 = vpack.c.bf16 %v1754_v22, %v1753_v16 }
 0x44b   : > { %2246 = vst [vmem:[#allocation2 + $0x78] sm:$0xff] %v2231_v18  }
 0x44c PF: > { %p2438_p9 = scmp.eq.s32.totalorder %s3034_s20, 5  ;;  %s2870_s21 = smov [#allocation14]  }
 0x44d   : > { %s1842_s1 = sshll.u32 %s2870_s21, 4  ;;  %s1843_s1 = int_to_ptr.vmem [resolvable:$true] %s1842_s1 }
 0x44e   : > { %s2726_s2 = scalar_lea.vmem %s1843_s1, 4096  ;;  %p2733_p7 = scmp.lt.s32.totalorder %s1843_s1, %s1843_s1 }
 0x44f   : > { %p2727_p11 = scmp.ne.s32.totalorder %s1843_s1, %s2726_s2  ;;  %p2734_p2 = scmp.lt.s32.totalorder %s2726_s2, %s2726_s2 }
 0x451   : > { %p2728_p12 = pnand %p2727_p11, %p2438_p9  ;;  %p2735_p5 = por %p2734_p2, %p2733_p7 }
 0x453   : > { %p2729_p10 = pneg %p2728_p12 }
 0x455   : > { %p2736_p0 = pnand %p2735_p5, %p2729_p10 }
 0x457   : > { %2739 = shalt.err (!%p2736_p0)
}
 0x458   : > { %s2871_s3 = smov 128   ;;  %s2872_s17 = smov 8  }
 0x459   : > { %s3649_s22 = sld [smem:[#allocation40_spill]] }
 0x45f   : > { %2418 = dma.vmem_to_hbm [thread:$0]  (%p2438_p9), %s1843_s1, 4096, %s3649_s22, [#allocation8], %s2871_s3, %s2871_s3, %s2872_s17  }
 0x460   : > { %2813 = dma.done.wait (%p2438_p9), [#allocation8], 4096  }
 0x461   : > { %2815 = vsyncadd (%p2438_p9), [#allocation8], 4294963200 }
 0x462 PF: > { %s27_s19 = sadd.s32 1, %s2858_s19   ;;  %s3650_s9 = sld [smem:[#allocation31_spill]] }
 0x463   : > { %p24_p3 = scmp.ge.s32.totalorder %s27_s19, 8   ;;  %s3651_s15 = sld [smem:[#allocation28_spill]] }
 0x464   : > { %s3652_s17 = sld [smem:[#allocation29_spill]]  ;;  %s3654_s30 = smov %s2822_s10 }
 0x465   : > { %s3653_s6 = sld [smem:[#allocation30_spill]]  ;;  %s3655_s10 = smov %s2826_s11 }
 0x466   : > { %s3656_s11 = smov %s3072_s29  ;;  %s3657_s12 = smov %s2834_s13 }
 0x467   : > { %s3658_s13 = smov %s2838_s14  ;;  %s3660_s16 = smov %s2854_s18 }
 0x468   : > { %s3659_s14 = smov %s3650_s9  ;;  %26 = sbr.rel (!%p24_p3) target bundleno = 21 (0x15), region = 164 }
 0x46b   : > { %s3661_s18 = smov %s3653_s6 }
 0x46d   :  { %1858 = vsyncpa [#allocation7], 1 }
 0x46e   :  { %1860 = vsyncpa [#allocation7 + $0x1], 1 }
 0x46f   :  { %1861 = vsyncpa [#allocation10], 1 }
 0x470   :  { %1863 = vsyncpa [#allocation10 + $0x1], 1 }
 0x471   :  { %1864 = vsyncpa [#allocation13], 1 }
 0x472   :  { %1866 = vsyncpa [#allocation13 + $0x1], 1 }
 0x473   :  { %1867 = vsyncpa [#allocation8], 1 }
 0x474   :  { %1869 = vsyncpa [#allocation8 + $0x1], 1 }

</bundles_post_ra>
